<compile_context>
chip_gen: v7x
topology: tpu7x:2x2x1
jax: 0.10.0
libtpu: 0.0.40
codegen_flags: <defaults>
</compile_context>

<pallas_src>
import functools

import jax
import jax.numpy as jnp
from jax import lax
from jax.experimental import pallas as pl
from jax.experimental.pallas import tpu as pltpu


# ----------------------------------------------------------------------------
# Fused kernel: all GRU layers + fc head, one pallas_call, grid over time chunks
# ----------------------------------------------------------------------------
def _make_fused_gru_kernel(num_layers):
    def kernel(x_ref, *refs):
        # refs layout: [w_ih, b_gi, w_hh, b_hn] * num_layers, fc_w, fc_b, out, h_scratch
        layer_refs = refs[: 4 * num_layers]
        fcw_ref, fcb_ref, out_ref, h_ref = refs[4 * num_layers:]

        c = pl.program_id(0)

        @pl.when(c == 0)
        def _():
            h_ref[...] = jnp.zeros_like(h_ref)  # torch default: h0 = zeros

        tc, b, _ = x_ref.shape

        # Load resident weights once per grid step; hoist bias broadcasts
        # out of the time loop (JAX does not CSE broadcast_in_dim).
        layers = []
        for l in range(num_layers):
            w_ih = layer_refs[4 * l][...]
            b_gi = jnp.broadcast_to(layer_refs[4 * l + 1][...],
                                    (b, layer_refs[4 * l + 1].shape[-1]))
            w_hh = layer_refs[4 * l + 2][...]
            b_hn = jnp.broadcast_to(layer_refs[4 * l + 3][...],
                                    (b, layer_refs[4 * l + 3].shape[-1]))
            layers.append((w_ih, b_gi, w_hh, b_hn))

        hs = [h_ref[l] for l in range(num_layers)]  # (B, H) each

        # Statically unrolled time loop; inside, layers are processed in order
        # so layer l sees layer l-1's output for the SAME time step.
        for t in range(tc):
            inp = x_ref[t]  # (B, D_in)
            for l in range(num_layers):
                w_ih, b_gi, w_hh, b_hn = layers[l]
                hid = w_hh.shape[0]
                gi = jnp.dot(inp, w_ih, preferred_element_type=jnp.float32) + b_gi
                gh = jnp.dot(hs[l], w_hh, preferred_element_type=jnp.float32)
                r = jax.nn.sigmoid(gi[:, 0:hid] + gh[:, 0:hid])
                z = jax.nn.sigmoid(gi[:, hid:2 * hid] + gh[:, hid:2 * hid])
                n = jnp.tanh(gi[:, 2 * hid:3 * hid]
                             + r * (gh[:, 2 * hid:3 * hid] + b_hn))
                h_new = (1.0 - z) * n + z * hs[l]
                hs[l] = h_new
                inp = h_new

        # Carry hidden states to the next time chunk.
        for l in range(num_layers):
            h_ref[l] = hs[l]

        # Final Linear head on the last hidden state of the last layer,
        # emitted only once (output block is resident across the grid).
        @pl.when(c == pl.num_programs(0) - 1)
        def _():
            out_ref[...] = (
                jnp.dot(hs[-1], fcw_ref[...], preferred_element_type=jnp.float32)
                + fcb_ref[...]
            ).astype(out_ref.dtype)

    return kernel


def _pick_time_chunk(T, max_chunk=16):
    tc = min(T, max_chunk)
    while T % tc:
        tc -= 1
    return tc


@functools.partial(jax.jit, static_argnames=("num_layers",))
def gru_forward(x_btd, params, num_layers):
    """Full module forward: multi-layer GRU -> last timestep -> Linear.

    x_btd: (B, T, input_dim), batch_first (matches the PyTorch module).
    Returns: (B, output_dim).
    """
    B, T, D = x_btd.shape
    seq = jnp.transpose(x_btd, (1, 0, 2)).astype(jnp.float32)  # (T, B, D)
    H = params["layer0"]["w_hh"].shape[0]
    O = params["fc_w"].shape[-1]
    Tc = _pick_time_chunk(T)

    args = [seq]
    in_specs = [pl.BlockSpec((Tc, B, D), lambda c: (c, 0, 0))]
    for l in range(num_layers):
        p = params[f"layer{l}"]
        d_in = p["w_ih"].shape[0]
        args += [p["w_ih"], p["b_gi"], p["w_hh"], p["b_hn"]]
        in_specs += [
            pl.BlockSpec((d_in, 3 * H), lambda c: (0, 0)),
            pl.BlockSpec((1, 3 * H), lambda c: (0, 0)),
            pl.BlockSpec((H, 3 * H), lambda c: (0, 0)),
            pl.BlockSpec((1, H), lambda c: (0, 0)),
        ]
    args += [params["fc_w"], params["fc_b"]]
    in_specs += [
        pl.BlockSpec((H, O), lambda c: (0, 0)),
        pl.BlockSpec((1, O), lambda c: (0, 0)),
    ]

    return pl.pallas_call(
        _make_fused_gru_kernel(num_layers),
        out_shape=jax.ShapeDtypeStruct((B, O), jnp.float32),
        grid_spec=pltpu.PrefetchScalarGridSpec(
            num_scalar_prefetch=0,
            grid=(T // Tc,),
            in_specs=in_specs,
            out_specs=pl.BlockSpec((B, O), lambda c: (0, 0)),
            scratch_shapes=[pltpu.VMEM((num_layers, B, H), jnp.float32)],
        ),
        compiler_params=pltpu.CompilerParams(dimension_semantics=("arbitrary",)),
    )(*args)


# ----------------------------------------------------------------------------
# Deterministic parameter init (same shapes/semantics as nn.GRU / nn.Linear)
# ----------------------------------------------------------------------------
def init_params(key, input_dim, hidden_dim, num_layers, output_dim):
    params = {}
    H = hidden_dim
    bound = 1.0 / jnp.sqrt(hidden_dim)
    for l in range(num_layers):
        d_in = input_dim if l == 0 else hidden_dim
        key, k1, k2, k3, k4 = jax.random.split(key, 5)
        # torch stores weight_ih_l{k}: (3H, d_in); we keep the transposed,
        # gate-fused layout (d_in, 3H), gate order (r, z, n).
        w_ih = jax.random.uniform(k1, (d_in, 3 * H), jnp.float32, -bound, bound)
        w_hh = jax.random.uniform(k2, (H, 3 * H), jnp.float32, -bound, bound)
        b_ih = jax.random.uniform(k3, (3 * H,), jnp.float32, -bound, bound)
        b_hh = jax.random.uniform(k4, (3 * H,), jnp.float32, -bound, bound)
        # Folded bias for the fused input projection: r/z gates absorb b_hh;
        # the n-gate hidden bias must stay inside the r*(.) term.
        b_gi = jnp.concatenate(
            [b_ih[0:H] + b_hh[0:H],
             b_ih[H:2 * H] + b_hh[H:2 * H],
             b_ih[2 * H:3 * H]]
        ).reshape(1, 3 * H)
        b_hn = b_hh[2 * H:3 * H].reshape(1, H)
        params[f"layer{l}"] = {
            "w_ih": w_ih, "w_hh": w_hh,
            "b_ih": b_ih, "b_hh": b_hh,      # raw (used by the reference)
            "b_gi": b_gi, "b_hn": b_hn,      # folded (used by the kernel)
        }
    key, k1, k2 = jax.random.split(key, 3)
    fbound = 1.0 / jnp.sqrt(hidden_dim)
    params["fc_w"] = jax.random.uniform(k1, (hidden_dim, output_dim),
                                        jnp.float32, -fbound, fbound)
    params["fc_b"] = jax.random.uniform(k2, (1, output_dim),
                                        jnp.float32, -fbound, fbound)
    return params


# ----------------------------------------------------------------------------
# Pure-JAX reference (mirrors torch.nn.GRU semantics) for a sanity check
# ----------------------------------------------------------------------------
def gru_forward_ref(x_btd, params, num_layers):
    x = jnp.transpose(x_btd, (1, 0, 2)).astype(jnp.float32)  # (T, B, D)
    for l in range(num_layers):
        p = params[f"layer{l}"]
        T, B, _ = x.shape
        H = p["w_hh"].shape[0]
        h = jnp.zeros((B, H), jnp.float32)
        outs = []
        for t in range(T):
            gi = x[t] @ p["w_ih"] + p["b_ih"]   # (B, 3H)  includes b_ih
            gh = h @ p["w_hh"] + p["b_hh"]      # (B, 3H)  includes b_hh
            r = jax.nn.sigmoid(gi[:, 0:H] + gh[:, 0:H])
            z = jax.nn.sigmoid(gi[:, H:2 * H] + gh[:, H:2 * H])
            n = jnp.tanh(gi[:, 2 * H:3 * H] + r * gh[:, 2 * H:3 * H])
            h = (1.0 - z) * n + z * h
            outs.append(h)
        x = jnp.stack(outs, axis=0)
    return x[-1] @ params["fc_w"] + params["fc_b"]


# ----------------------------------------------------------------------------
if __name__ == "__main__":
    INPUT_DIM, HIDDEN_DIM, NUM_LAYERS, OUTPUT_DIM = 16, 32, 2, 8
    B, T = 2, 8

    key = jax.random.PRNGKey(0)
    key, pkey, xkey = jax.random.split(key, 3)
    params = init_params(pkey, INPUT_DIM, HIDDEN_DIM, NUM_LAYERS, OUTPUT_DIM)
    x = jax.random.normal(xkey, (B, T, INPUT_DIM), jnp.float32)

    out = gru_forward(x, params, NUM_LAYERS)
    out = jax.block_until_ready(out)

    ref = gru_forward_ref(x, params, NUM_LAYERS)
    assert out.shape == (B, OUTPUT_DIM)
    assert jnp.allclose(out, ref, atol=1e-4, rtol=1e-4), "mismatch vs reference"

    print("KERNEL_OK")
</pallas_src>

<mosaic_0001>
module attributes {stable_mosaic.version = 11 : i64} {
  func.func @kernel(%arg0: i32, %arg1: memref<8x2x16xf32, #tpu.memory_space<vmem>>, %arg2: memref<16x96xf32, #tpu.memory_space<vmem>>, %arg3: memref<1x96xf32, #tpu.memory_space<vmem>>, %arg4: memref<32x96xf32, #tpu.memory_space<vmem>>, %arg5: memref<1x32xf32, #tpu.memory_space<vmem>>, %arg6: memref<32x96xf32, #tpu.memory_space<vmem>>, %arg7: memref<1x96xf32, #tpu.memory_space<vmem>>, %arg8: memref<32x96xf32, #tpu.memory_space<vmem>>, %arg9: memref<1x32xf32, #tpu.memory_space<vmem>>, %arg10: memref<32x8xf32, #tpu.memory_space<vmem>>, %arg11: memref<1x8xf32, #tpu.memory_space<vmem>>, %arg12: memref<2x8xf32, #tpu.memory_space<vmem>>, %arg13: memref<2x2x32xf32, #tpu.memory_space<vmem>>) attributes {dimension_semantics = [#tpu.dimension_semantics<arbitrary>], iteration_bounds = array<i64: 1>, scalar_prefetch = 0 : i64, scratch_operands = 1 : i64, tpu.core_type = #tpu.core_type<tc>, window_params = [{transform_indices = @transform_0, window_bounds = array<i64: 8, 2, 16>}, {pipeline_mode = #tpu.pipeline_mode<synchronous>, transform_indices = @transform_1, window_bounds = array<i64: 16, 96>}, {pipeline_mode = #tpu.pipeline_mode<synchronous>, transform_indices = @transform_2, window_bounds = array<i64: 1, 96>}, {pipeline_mode = #tpu.pipeline_mode<synchronous>, transform_indices = @transform_3, window_bounds = array<i64: 32, 96>}, {pipeline_mode = #tpu.pipeline_mode<synchronous>, transform_indices = @transform_4, window_bounds = array<i64: 1, 32>}, {pipeline_mode = #tpu.pipeline_mode<synchronous>, transform_indices = @transform_5, window_bounds = array<i64: 32, 96>}, {pipeline_mode = #tpu.pipeline_mode<synchronous>, transform_indices = @transform_6, window_bounds = array<i64: 1, 96>}, {pipeline_mode = #tpu.pipeline_mode<synchronous>, transform_indices = @transform_7, window_bounds = array<i64: 32, 96>}, {pipeline_mode = #tpu.pipeline_mode<synchronous>, transform_indices = @transform_8, window_bounds = array<i64: 1, 32>}, {pipeline_mode = #tpu.pipeline_mode<synchronous>, transform_indices = @transform_9, window_bounds = array<i64: 32, 8>}, {pipeline_mode = #tpu.pipeline_mode<synchronous>, transform_indices = @transform_10, window_bounds = array<i64: 1, 8>}, {pipeline_mode = #tpu.pipeline_mode<synchronous>, transform_indices = @transform_11, window_bounds = array<i64: 2, 8>}]} {
    %c0_i32 = arith.constant 0 : i32
    %0 = arith.cmpi eq, %arg0, %c0_i32 : i32
    %1 = arith.extui %0 : i1 to i32
    %c0_i32_0 = arith.constant 0 : i32
    %2 = arith.cmpi ne, %1, %c0_i32_0 : i32
    scf.if %2 {
      %cst_126 = arith.constant 0.000000e+00 : f32
      %528 = vector.broadcast %cst_126 : f32 to vector<2x2x32xf32>
      %c0_127 = arith.constant 0 : index
      %c0_128 = arith.constant 0 : index
      %c0_129 = arith.constant 0 : index
      %529 = vector.load %arg13[%c0_127, %c0_128, %c0_129] : memref<2x2x32xf32, #tpu.memory_space<vmem>>, vector<2x2x32xf32>
      tpu.vector_store %arg13[%c0_127, %c0_128, %c0_129], %528 {strides = array<i32>} : memref<2x2x32xf32, #tpu.memory_space<vmem>>, vector<2x2x32xf32>,
    } else {
    }
    %c0 = arith.constant 0 : index
    %c0_1 = arith.constant 0 : index
    %3 = vector.load %arg2[%c0, %c0_1] : memref<16x96xf32, #tpu.memory_space<vmem>>, vector<16x96xf32>
    %c0_2 = arith.constant 0 : index
    %c0_3 = arith.constant 0 : index
    %4 = vector.load %arg3[%c0_2, %c0_3] : memref<1x96xf32, #tpu.memory_space<vmem>>, vector<1x96xf32>
    %5 = vector.shape_cast %4 : vector<1x96xf32> to vector<1x96xf32>
    %6 = vector.broadcast %5 : vector<1x96xf32> to vector<2x96xf32>
    %c0_4 = arith.constant 0 : index
    %c0_5 = arith.constant 0 : index
    %7 = vector.load %arg4[%c0_4, %c0_5] : memref<32x96xf32, #tpu.memory_space<vmem>>, vector<32x96xf32>
    %c0_6 = arith.constant 0 : index
    %c0_7 = arith.constant 0 : index
    %8 = vector.load %arg5[%c0_6, %c0_7] : memref<1x32xf32, #tpu.memory_space<vmem>>, vector<1x32xf32>
    %9 = vector.shape_cast %8 : vector<1x32xf32> to vector<1x32xf32>
    %10 = vector.broadcast %9 : vector<1x32xf32> to vector<2x32xf32>
    %c0_8 = arith.constant 0 : index
    %c0_9 = arith.constant 0 : index
    %11 = vector.load %arg6[%c0_8, %c0_9] : memref<32x96xf32, #tpu.memory_space<vmem>>, vector<32x96xf32>
    %c0_10 = arith.constant 0 : index
    %c0_11 = arith.constant 0 : index
    %12 = vector.load %arg7[%c0_10, %c0_11] : memref<1x96xf32, #tpu.memory_space<vmem>>, vector<1x96xf32>
    %13 = vector.shape_cast %12 : vector<1x96xf32> to vector<1x96xf32>
    %14 = vector.broadcast %13 : vector<1x96xf32> to vector<2x96xf32>
    %c0_12 = arith.constant 0 : index
    %c0_13 = arith.constant 0 : index
    %15 = vector.load %arg8[%c0_12, %c0_13] : memref<32x96xf32, #tpu.memory_space<vmem>>, vector<32x96xf32>
    %c0_14 = arith.constant 0 : index
    %c0_15 = arith.constant 0 : index
    %16 = vector.load %arg9[%c0_14, %c0_15] : memref<1x32xf32, #tpu.memory_space<vmem>>, vector<1x32xf32>
    %17 = vector.shape_cast %16 : vector<1x32xf32> to vector<1x32xf32>
    %18 = vector.broadcast %17 : vector<1x32xf32> to vector<2x32xf32>
    %c0_16 = arith.constant 0 : index
    %c0_17 = arith.constant 0 : index
    %c0_18 = arith.constant 0 : index
    %19 = vector.load %arg13[%c0_16, %c0_17, %c0_18] : memref<2x2x32xf32, #tpu.memory_space<vmem>>, vector<1x2x32xf32>
    %20 = vector.shape_cast %19 : vector<1x2x32xf32> to vector<2x32xf32>
    %c1 = arith.constant 1 : index
    %c0_19 = arith.constant 0 : index
    %c0_20 = arith.constant 0 : index
    %21 = vector.load %arg13[%c1, %c0_19, %c0_20] : memref<2x2x32xf32, #tpu.memory_space<vmem>>, vector<1x2x32xf32>
    %22 = vector.shape_cast %21 : vector<1x2x32xf32> to vector<2x32xf32>
    %c0_21 = arith.constant 0 : index
    %c0_22 = arith.constant 0 : index
    %c0_23 = arith.constant 0 : index
    %23 = vector.load %arg1[%c0_21, %c0_22, %c0_23] : memref<8x2x16xf32, #tpu.memory_space<vmem>>, vector<1x2x16xf32>
    %24 = vector.shape_cast %23 : vector<1x2x16xf32> to vector<2x16xf32>
    %cst = arith.constant dense<0.000000e+00> : vector<2x96xf32>
    %25 = tpu.matmul %24, %3, %cst {dimension_numbers = #tpu.dot_dimension_numbers<[1], [0], [0], [1], [0, 0, 1, 1], [], []>} : vector<2x16xf32>, vector<16x96xf32>, vector<2x96xf32> -> vector<2x96xf32>
    %26 = arith.addf %25, %6 : vector<2x96xf32>
    %cst_24 = arith.constant dense<0.000000e+00> : vector<2x96xf32>
    %27 = tpu.matmul %20, %7, %cst_24 {dimension_numbers = #tpu.dot_dimension_numbers<[1], [0], [0], [1], [0, 0, 1, 1], [], []>} : vector<2x32xf32>, vector<32x96xf32>, vector<2x96xf32> -> vector<2x96xf32>
    %28 = vector.extract_strided_slice %26 {offsets = [0, 0], sizes = [2, 32], strides = [1, 1]} : vector<2x96xf32> to vector<2x32xf32>
    %29 = vector.extract_strided_slice %27 {offsets = [0, 0], sizes = [2, 32], strides = [1, 1]} : vector<2x96xf32> to vector<2x32xf32>
    %30 = arith.addf %28, %29 : vector<2x32xf32>
    %31 = arith.negf %30 : vector<2x32xf32>
    %32 = math.exp %31 : vector<2x32xf32>
    %cst_25 = arith.constant 1.000000e+00 : f32
    %33 = vector.broadcast %cst_25 : f32 to vector<2x32xf32>
    %34 = arith.addf %33, %32 : vector<2x32xf32>
    %35 = arith.divf %33, %34 : vector<2x32xf32>
    %36 = vector.extract_strided_slice %26 {offsets = [0, 32], sizes = [2, 32], strides = [1, 1]} : vector<2x96xf32> to vector<2x32xf32>
    %37 = vector.extract_strided_slice %27 {offsets = [0, 32], sizes = [2, 32], strides = [1, 1]} : vector<2x96xf32> to vector<2x32xf32>
    %38 = arith.addf %36, %37 : vector<2x32xf32>
    %39 = arith.negf %38 : vector<2x32xf32>
    %40 = math.exp %39 : vector<2x32xf32>
    %cst_26 = arith.constant 1.000000e+00 : f32
    %41 = vector.broadcast %cst_26 : f32 to vector<2x32xf32>
    %42 = arith.addf %41, %40 : vector<2x32xf32>
    %43 = arith.divf %41, %42 : vector<2x32xf32>
    %44 = vector.extract_strided_slice %26 {offsets = [0, 64], sizes = [2, 32], strides = [1, 1]} : vector<2x96xf32> to vector<2x32xf32>
    %45 = vector.extract_strided_slice %27 {offsets = [0, 64], sizes = [2, 32], strides = [1, 1]} : vector<2x96xf32> to vector<2x32xf32>
    %46 = arith.addf %45, %10 : vector<2x32xf32>
    %47 = arith.mulf %35, %46 : vector<2x32xf32>
    %48 = arith.addf %44, %47 : vector<2x32xf32>
    %49 = math.tanh %48 : vector<2x32xf32>
    %cst_27 = arith.constant 1.000000e+00 : f32
    %50 = vector.broadcast %cst_27 : f32 to vector<2x32xf32>
    %51 = arith.subf %50, %43 : vector<2x32xf32>
    %52 = arith.mulf %51, %49 : vector<2x32xf32>
    %53 = arith.mulf %43, %20 : vector<2x32xf32>
    %54 = arith.addf %52, %53 : vector<2x32xf32>
    %cst_28 = arith.constant dense<0.000000e+00> : vector<2x96xf32>
    %55 = tpu.matmul %54, %11, %cst_28 {dimension_numbers = #tpu.dot_dimension_numbers<[1], [0], [0], [1], [0, 0, 1, 1], [], []>} : vector<2x32xf32>, vector<32x96xf32>, vector<2x96xf32> -> vector<2x96xf32>
    %56 = arith.addf %55, %14 : vector<2x96xf32>
    %cst_29 = arith.constant dense<0.000000e+00> : vector<2x96xf32>
    %57 = tpu.matmul %22, %15, %cst_29 {dimension_numbers = #tpu.dot_dimension_numbers<[1], [0], [0], [1], [0, 0, 1, 1], [], []>} : vector<2x32xf32>, vector<32x96xf32>, vector<2x96xf32> -> vector<2x96xf32>
    %58 = vector.extract_strided_slice %56 {offsets = [0, 0], sizes = [2, 32], strides = [1, 1]} : vector<2x96xf32> to vector<2x32xf32>
    %59 = vector.extract_strided_slice %57 {offsets = [0, 0], sizes = [2, 32], strides = [1, 1]} : vector<2x96xf32> to vector<2x32xf32>
    %60 = arith.addf %58, %59 : vector<2x32xf32>
    %61 = arith.negf %60 : vector<2x32xf32>
    %62 = math.exp %61 : vector<2x32xf32>
    %cst_30 = arith.constant 1.000000e+00 : f32
    %63 = vector.broadcast %cst_30 : f32 to vector<2x32xf32>
    %64 = arith.addf %63, %62 : vector<2x32xf32>
    %65 = arith.divf %63, %64 : vector<2x32xf32>
    %66 = vector.extract_strided_slice %56 {offsets = [0, 32], sizes = [2, 32], strides = [1, 1]} : vector<2x96xf32> to vector<2x32xf32>
    %67 = vector.extract_strided_slice %57 {offsets = [0, 32], sizes = [2, 32], strides = [1, 1]} : vector<2x96xf32> to vector<2x32xf32>
    %68 = arith.addf %66, %67 : vector<2x32xf32>
    %69 = arith.negf %68 : vector<2x32xf32>
    %70 = math.exp %69 : vector<2x32xf32>
    %cst_31 = arith.constant 1.000000e+00 : f32
    %71 = vector.broadcast %cst_31 : f32 to vector<2x32xf32>
    %72 = arith.addf %71, %70 : vector<2x32xf32>
    %73 = arith.divf %71, %72 : vector<2x32xf32>
    %74 = vector.extract_strided_slice %56 {offsets = [0, 64], sizes = [2, 32], strides = [1, 1]} : vector<2x96xf32> to vector<2x32xf32>
    %75 = vector.extract_strided_slice %57 {offsets = [0, 64], sizes = [2, 32], strides = [1, 1]} : vector<2x96xf32> to vector<2x32xf32>
    %76 = arith.addf %75, %18 : vector<2x32xf32>
    %77 = arith.mulf %65, %76 : vector<2x32xf32>
    %78 = arith.addf %74, %77 : vector<2x32xf32>
    %79 = math.tanh %78 : vector<2x32xf32>
    %cst_32 = arith.constant 1.000000e+00 : f32
    %80 = vector.broadcast %cst_32 : f32 to vector<2x32xf32>
    %81 = arith.subf %80, %73 : vector<2x32xf32>
    %82 = arith.mulf %81, %79 : vector<2x32xf32>
    %83 = arith.mulf %73, %22 : vector<2x32xf32>
    %84 = arith.addf %82, %83 : vector<2x32xf32>
    %c1_33 = arith.constant 1 : index
    %c0_34 = arith.constant 0 : index
    %c0_35 = arith.constant 0 : index
    %85 = vector.load %arg1[%c1_33, %c0_34, %c0_35] : memref<8x2x16xf32, #tpu.memory_space<vmem>>, vector<1x2x16xf32>
    %86 = vector.shape_cast %85 : vector<1x2x16xf32> to vector<2x16xf32>
    %cst_36 = arith.constant dense<0.000000e+00> : vector<2x96xf32>
    %87 = tpu.matmul %86, %3, %cst_36 {dimension_numbers = #tpu.dot_dimension_numbers<[1], [0], [0], [1], [0, 0, 1, 1], [], []>} : vector<2x16xf32>, vector<16x96xf32>, vector<2x96xf32> -> vector<2x96xf32>
    %88 = arith.addf %87, %6 : vector<2x96xf32>
    %cst_37 = arith.constant dense<0.000000e+00> : vector<2x96xf32>
    %89 = tpu.matmul %54, %7, %cst_37 {dimension_numbers = #tpu.dot_dimension_numbers<[1], [0], [0], [1], [0, 0, 1, 1], [], []>} : vector<2x32xf32>, vector<32x96xf32>, vector<2x96xf32> -> vector<2x96xf32>
    %90 = vector.extract_strided_slice %88 {offsets = [0, 0], sizes = [2, 32], strides = [1, 1]} : vector<2x96xf32> to vector<2x32xf32>
    %91 = vector.extract_strided_slice %89 {offsets = [0, 0], sizes = [2, 32], strides = [1, 1]} : vector<2x96xf32> to vector<2x32xf32>
    %92 = arith.addf %90, %91 : vector<2x32xf32>
    %93 = arith.negf %92 : vector<2x32xf32>
    %94 = math.exp %93 : vector<2x32xf32>
    %cst_38 = arith.constant 1.000000e+00 : f32
    %95 = vector.broadcast %cst_38 : f32 to vector<2x32xf32>
    %96 = arith.addf %95, %94 : vector<2x32xf32>
    %97 = arith.divf %95, %96 : vector<2x32xf32>
    %98 = vector.extract_strided_slice %88 {offsets = [0, 32], sizes = [2, 32], strides = [1, 1]} : vector<2x96xf32> to vector<2x32xf32>
    %99 = vector.extract_strided_slice %89 {offsets = [0, 32], sizes = [2, 32], strides = [1, 1]} : vector<2x96xf32> to vector<2x32xf32>
    %100 = arith.addf %98, %99 : vector<2x32xf32>
    %101 = arith.negf %100 : vector<2x32xf32>
    %102 = math.exp %101 : vector<2x32xf32>
    %cst_39 = arith.constant 1.000000e+00 : f32
    %103 = vector.broadcast %cst_39 : f32 to vector<2x32xf32>
    %104 = arith.addf %103, %102 : vector<2x32xf32>
    %105 = arith.divf %103, %104 : vector<2x32xf32>
    %106 = vector.extract_strided_slice %88 {offsets = [0, 64], sizes = [2, 32], strides = [1, 1]} : vector<2x96xf32> to vector<2x32xf32>
    %107 = vector.extract_strided_slice %89 {offsets = [0, 64], sizes = [2, 32], strides = [1, 1]} : vector<2x96xf32> to vector<2x32xf32>
    %108 = arith.addf %107, %10 : vector<2x32xf32>
    %109 = arith.mulf %97, %108 : vector<2x32xf32>
    %110 = arith.addf %106, %109 : vector<2x32xf32>
    %111 = math.tanh %110 : vector<2x32xf32>
    %cst_40 = arith.constant 1.000000e+00 : f32
    %112 = vector.broadcast %cst_40 : f32 to vector<2x32xf32>
    %113 = arith.subf %112, %105 : vector<2x32xf32>
    %114 = arith.mulf %113, %111 : vector<2x32xf32>
    %115 = arith.mulf %105, %54 : vector<2x32xf32>
    %116 = arith.addf %114, %115 : vector<2x32xf32>
    %cst_41 = arith.constant dense<0.000000e+00> : vector<2x96xf32>
    %117 = tpu.matmul %116, %11, %cst_41 {dimension_numbers = #tpu.dot_dimension_numbers<[1], [0], [0], [1], [0, 0, 1, 1], [], []>} : vector<2x32xf32>, vector<32x96xf32>, vector<2x96xf32> -> vector<2x96xf32>
    %118 = arith.addf %117, %14 : vector<2x96xf32>
    %cst_42 = arith.constant dense<0.000000e+00> : vector<2x96xf32>
    %119 = tpu.matmul %84, %15, %cst_42 {dimension_numbers = #tpu.dot_dimension_numbers<[1], [0], [0], [1], [0, 0, 1, 1], [], []>} : vector<2x32xf32>, vector<32x96xf32>, vector<2x96xf32> -> vector<2x96xf32>
    %120 = vector.extract_strided_slice %118 {offsets = [0, 0], sizes = [2, 32], strides = [1, 1]} : vector<2x96xf32> to vector<2x32xf32>
    %121 = vector.extract_strided_slice %119 {offsets = [0, 0], sizes = [2, 32], strides = [1, 1]} : vector<2x96xf32> to vector<2x32xf32>
    %122 = arith.addf %120, %121 : vector<2x32xf32>
    %123 = arith.negf %122 : vector<2x32xf32>
    %124 = math.exp %123 : vector<2x32xf32>
    %cst_43 = arith.constant 1.000000e+00 : f32
    %125 = vector.broadcast %cst_43 : f32 to vector<2x32xf32>
    %126 = arith.addf %125, %124 : vector<2x32xf32>
    %127 = arith.divf %125, %126 : vector<2x32xf32>
    %128 = vector.extract_strided_slice %118 {offsets = [0, 32], sizes = [2, 32], strides = [1, 1]} : vector<2x96xf32> to vector<2x32xf32>
    %129 = vector.extract_strided_slice %119 {offsets = [0, 32], sizes = [2, 32], strides = [1, 1]} : vector<2x96xf32> to vector<2x32xf32>
    %130 = arith.addf %128, %129 : vector<2x32xf32>
    %131 = arith.negf %130 : vector<2x32xf32>
    %132 = math.exp %131 : vector<2x32xf32>
    %cst_44 = arith.constant 1.000000e+00 : f32
    %133 = vector.broadcast %cst_44 : f32 to vector<2x32xf32>
    %134 = arith.addf %133, %132 : vector<2x32xf32>
    %135 = arith.divf %133, %134 : vector<2x32xf32>
    %136 = vector.extract_strided_slice %118 {offsets = [0, 64], sizes = [2, 32], strides = [1, 1]} : vector<2x96xf32> to vector<2x32xf32>
    %137 = vector.extract_strided_slice %119 {offsets = [0, 64], sizes = [2, 32], strides = [1, 1]} : vector<2x96xf32> to vector<2x32xf32>
    %138 = arith.addf %137, %18 : vector<2x32xf32>
    %139 = arith.mulf %127, %138 : vector<2x32xf32>
    %140 = arith.addf %136, %139 : vector<2x32xf32>
    %141 = math.tanh %140 : vector<2x32xf32>
    %cst_45 = arith.constant 1.000000e+00 : f32
    %142 = vector.broadcast %cst_45 : f32 to vector<2x32xf32>
    %143 = arith.subf %142, %135 : vector<2x32xf32>
    %144 = arith.mulf %143, %141 : vector<2x32xf32>
    %145 = arith.mulf %135, %84 : vector<2x32xf32>
    %146 = arith.addf %144, %145 : vector<2x32xf32>
    %c2 = arith.constant 2 : index
    %c0_46 = arith.constant 0 : index
    %c0_47 = arith.constant 0 : index
    %147 = vector.load %arg1[%c2, %c0_46, %c0_47] : memref<8x2x16xf32, #tpu.memory_space<vmem>>, vector<1x2x16xf32>
    %148 = vector.shape_cast %147 : vector<1x2x16xf32> to vector<2x16xf32>
    %cst_48 = arith.constant dense<0.000000e+00> : vector<2x96xf32>
    %149 = tpu.matmul %148, %3, %cst_48 {dimension_numbers = #tpu.dot_dimension_numbers<[1], [0], [0], [1], [0, 0, 1, 1], [], []>} : vector<2x16xf32>, vector<16x96xf32>, vector<2x96xf32> -> vector<2x96xf32>
    %150 = arith.addf %149, %6 : vector<2x96xf32>
    %cst_49 = arith.constant dense<0.000000e+00> : vector<2x96xf32>
    %151 = tpu.matmul %116, %7, %cst_49 {dimension_numbers = #tpu.dot_dimension_numbers<[1], [0], [0], [1], [0, 0, 1, 1], [], []>} : vector<2x32xf32>, vector<32x96xf32>, vector<2x96xf32> -> vector<2x96xf32>
    %152 = vector.extract_strided_slice %150 {offsets = [0, 0], sizes = [2, 32], strides = [1, 1]} : vector<2x96xf32> to vector<2x32xf32>
    %153 = vector.extract_strided_slice %151 {offsets = [0, 0], sizes = [2, 32], strides = [1, 1]} : vector<2x96xf32> to vector<2x32xf32>
    %154 = arith.addf %152, %153 : vector<2x32xf32>
    %155 = arith.negf %154 : vector<2x32xf32>
    %156 = math.exp %155 : vector<2x32xf32>
    %cst_50 = arith.constant 1.000000e+00 : f32
    %157 = vector.broadcast %cst_50 : f32 to vector<2x32xf32>
    %158 = arith.addf %157, %156 : vector<2x32xf32>
    %159 = arith.divf %157, %158 : vector<2x32xf32>
    %160 = vector.extract_strided_slice %150 {offsets = [0, 32], sizes = [2, 32], strides = [1, 1]} : vector<2x96xf32> to vector<2x32xf32>
    %161 = vector.extract_strided_slice %151 {offsets = [0, 32], sizes = [2, 32], strides = [1, 1]} : vector<2x96xf32> to vector<2x32xf32>
    %162 = arith.addf %160, %161 : vector<2x32xf32>
    %163 = arith.negf %162 : vector<2x32xf32>
    %164 = math.exp %163 : vector<2x32xf32>
    %cst_51 = arith.constant 1.000000e+00 : f32
    %165 = vector.broadcast %cst_51 : f32 to vector<2x32xf32>
    %166 = arith.addf %165, %164 : vector<2x32xf32>
    %167 = arith.divf %165, %166 : vector<2x32xf32>
    %168 = vector.extract_strided_slice %150 {offsets = [0, 64], sizes = [2, 32], strides = [1, 1]} : vector<2x96xf32> to vector<2x32xf32>
    %169 = vector.extract_strided_slice %151 {offsets = [0, 64], sizes = [2, 32], strides = [1, 1]} : vector<2x96xf32> to vector<2x32xf32>
    %170 = arith.addf %169, %10 : vector<2x32xf32>
    %171 = arith.mulf %159, %170 : vector<2x32xf32>
    %172 = arith.addf %168, %171 : vector<2x32xf32>
    %173 = math.tanh %172 : vector<2x32xf32>
    %cst_52 = arith.constant 1.000000e+00 : f32
    %174 = vector.broadcast %cst_52 : f32 to vector<2x32xf32>
    %175 = arith.subf %174, %167 : vector<2x32xf32>
    %176 = arith.mulf %175, %173 : vector<2x32xf32>
    %177 = arith.mulf %167, %116 : vector<2x32xf32>
    %178 = arith.addf %176, %177 : vector<2x32xf32>
    %cst_53 = arith.constant dense<0.000000e+00> : vector<2x96xf32>
    %179 = tpu.matmul %178, %11, %cst_53 {dimension_numbers = #tpu.dot_dimension_numbers<[1], [0], [0], [1], [0, 0, 1, 1], [], []>} : vector<2x32xf32>, vector<32x96xf32>, vector<2x96xf32> -> vector<2x96xf32>
    %180 = arith.addf %179, %14 : vector<2x96xf32>
    %cst_54 = arith.constant dense<0.000000e+00> : vector<2x96xf32>
    %181 = tpu.matmul %146, %15, %cst_54 {dimension_numbers = #tpu.dot_dimension_numbers<[1], [0], [0], [1], [0, 0, 1, 1], [], []>} : vector<2x32xf32>, vector<32x96xf32>, vector<2x96xf32> -> vector<2x96xf32>
    %182 = vector.extract_strided_slice %180 {offsets = [0, 0], sizes = [2, 32], strides = [1, 1]} : vector<2x96xf32> to vector<2x32xf32>
    %183 = vector.extract_strided_slice %181 {offsets = [0, 0], sizes = [2, 32], strides = [1, 1]} : vector<2x96xf32> to vector<2x32xf32>
    %184 = arith.addf %182, %183 : vector<2x32xf32>
    %185 = arith.negf %184 : vector<2x32xf32>
    %186 = math.exp %185 : vector<2x32xf32>
    %cst_55 = arith.constant 1.000000e+00 : f32
    %187 = vector.broadcast %cst_55 : f32 to vector<2x32xf32>
    %188 = arith.addf %187, %186 : vector<2x32xf32>
    %189 = arith.divf %187, %188 : vector<2x32xf32>
    %190 = vector.extract_strided_slice %180 {offsets = [0, 32], sizes = [2, 32], strides = [1, 1]} : vector<2x96xf32> to vector<2x32xf32>
    %191 = vector.extract_strided_slice %181 {offsets = [0, 32], sizes = [2, 32], strides = [1, 1]} : vector<2x96xf32> to vector<2x32xf32>
    %192 = arith.addf %190, %191 : vector<2x32xf32>
    %193 = arith.negf %192 : vector<2x32xf32>
    %194 = math.exp %193 : vector<2x32xf32>
    %cst_56 = arith.constant 1.000000e+00 : f32
    %195 = vector.broadcast %cst_56 : f32 to vector<2x32xf32>
    %196 = arith.addf %195, %194 : vector<2x32xf32>
    %197 = arith.divf %195, %196 : vector<2x32xf32>
    %198 = vector.extract_strided_slice %180 {offsets = [0, 64], sizes = [2, 32], strides = [1, 1]} : vector<2x96xf32> to vector<2x32xf32>
    %199 = vector.extract_strided_slice %181 {offsets = [0, 64], sizes = [2, 32], strides = [1, 1]} : vector<2x96xf32> to vector<2x32xf32>
    %200 = arith.addf %199, %18 : vector<2x32xf32>
    %201 = arith.mulf %189, %200 : vector<2x32xf32>
    %202 = arith.addf %198, %201 : vector<2x32xf32>
    %203 = math.tanh %202 : vector<2x32xf32>
    %cst_57 = arith.constant 1.000000e+00 : f32
    %204 = vector.broadcast %cst_57 : f32 to vector<2x32xf32>
    %205 = arith.subf %204, %197 : vector<2x32xf32>
    %206 = arith.mulf %205, %203 : vector<2x32xf32>
    %207 = arith.mulf %197, %146 : vector<2x32xf32>
    %208 = arith.addf %206, %207 : vector<2x32xf32>
    %c3 = arith.constant 3 : index
    %c0_58 = arith.constant 0 : index
    %c0_59 = arith.constant 0 : index
    %209 = vector.load %arg1[%c3, %c0_58, %c0_59] : memref<8x2x16xf32, #tpu.memory_space<vmem>>, vector<1x2x16xf32>
    %210 = vector.shape_cast %209 : vector<1x2x16xf32> to vector<2x16xf32>
    %cst_60 = arith.constant dense<0.000000e+00> : vector<2x96xf32>
    %211 = tpu.matmul %210, %3, %cst_60 {dimension_numbers = #tpu.dot_dimension_numbers<[1], [0], [0], [1], [0, 0, 1, 1], [], []>} : vector<2x16xf32>, vector<16x96xf32>, vector<2x96xf32> -> vector<2x96xf32>
    %212 = arith.addf %211, %6 : vector<2x96xf32>
    %cst_61 = arith.constant dense<0.000000e+00> : vector<2x96xf32>
    %213 = tpu.matmul %178, %7, %cst_61 {dimension_numbers = #tpu.dot_dimension_numbers<[1], [0], [0], [1], [0, 0, 1, 1], [], []>} : vector<2x32xf32>, vector<32x96xf32>, vector<2x96xf32> -> vector<2x96xf32>
    %214 = vector.extract_strided_slice %212 {offsets = [0, 0], sizes = [2, 32], strides = [1, 1]} : vector<2x96xf32> to vector<2x32xf32>
    %215 = vector.extract_strided_slice %213 {offsets = [0, 0], sizes = [2, 32], strides = [1, 1]} : vector<2x96xf32> to vector<2x32xf32>
    %216 = arith.addf %214, %215 : vector<2x32xf32>
    %217 = arith.negf %216 : vector<2x32xf32>
    %218 = math.exp %217 : vector<2x32xf32>
    %cst_62 = arith.constant 1.000000e+00 : f32
    %219 = vector.broadcast %cst_62 : f32 to vector<2x32xf32>
    %220 = arith.addf %219, %218 : vector<2x32xf32>
    %221 = arith.divf %219, %220 : vector<2x32xf32>
    %222 = vector.extract_strided_slice %212 {offsets = [0, 32], sizes = [2, 32], strides = [1, 1]} : vector<2x96xf32> to vector<2x32xf32>
    %223 = vector.extract_strided_slice %213 {offsets = [0, 32], sizes = [2, 32], strides = [1, 1]} : vector<2x96xf32> to vector<2x32xf32>
    %224 = arith.addf %222, %223 : vector<2x32xf32>
    %225 = arith.negf %224 : vector<2x32xf32>
    %226 = math.exp %225 : vector<2x32xf32>
    %cst_63 = arith.constant 1.000000e+00 : f32
    %227 = vector.broadcast %cst_63 : f32 to vector<2x32xf32>
    %228 = arith.addf %227, %226 : vector<2x32xf32>
    %229 = arith.divf %227, %228 : vector<2x32xf32>
    %230 = vector.extract_strided_slice %212 {offsets = [0, 64], sizes = [2, 32], strides = [1, 1]} : vector<2x96xf32> to vector<2x32xf32>
    %231 = vector.extract_strided_slice %213 {offsets = [0, 64], sizes = [2, 32], strides = [1, 1]} : vector<2x96xf32> to vector<2x32xf32>
    %232 = arith.addf %231, %10 : vector<2x32xf32>
    %233 = arith.mulf %221, %232 : vector<2x32xf32>
    %234 = arith.addf %230, %233 : vector<2x32xf32>
    %235 = math.tanh %234 : vector<2x32xf32>
    %cst_64 = arith.constant 1.000000e+00 : f32
    %236 = vector.broadcast %cst_64 : f32 to vector<2x32xf32>
    %237 = arith.subf %236, %229 : vector<2x32xf32>
    %238 = arith.mulf %237, %235 : vector<2x32xf32>
    %239 = arith.mulf %229, %178 : vector<2x32xf32>
    %240 = arith.addf %238, %239 : vector<2x32xf32>
    %cst_65 = arith.constant dense<0.000000e+00> : vector<2x96xf32>
    %241 = tpu.matmul %240, %11, %cst_65 {dimension_numbers = #tpu.dot_dimension_numbers<[1], [0], [0], [1], [0, 0, 1, 1], [], []>} : vector<2x32xf32>, vector<32x96xf32>, vector<2x96xf32> -> vector<2x96xf32>
    %242 = arith.addf %241, %14 : vector<2x96xf32>
    %cst_66 = arith.constant dense<0.000000e+00> : vector<2x96xf32>
    %243 = tpu.matmul %208, %15, %cst_66 {dimension_numbers = #tpu.dot_dimension_numbers<[1], [0], [0], [1], [0, 0, 1, 1], [], []>} : vector<2x32xf32>, vector<32x96xf32>, vector<2x96xf32> -> vector<2x96xf32>
    %244 = vector.extract_strided_slice %242 {offsets = [0, 0], sizes = [2, 32], strides = [1, 1]} : vector<2x96xf32> to vector<2x32xf32>
    %245 = vector.extract_strided_slice %243 {offsets = [0, 0], sizes = [2, 32], strides = [1, 1]} : vector<2x96xf32> to vector<2x32xf32>
    %246 = arith.addf %244, %245 : vector<2x32xf32>
    %247 = arith.negf %246 : vector<2x32xf32>
    %248 = math.exp %247 : vector<2x32xf32>
    %cst_67 = arith.constant 1.000000e+00 : f32
    %249 = vector.broadcast %cst_67 : f32 to vector<2x32xf32>
    %250 = arith.addf %249, %248 : vector<2x32xf32>
    %251 = arith.divf %249, %250 : vector<2x32xf32>
    %252 = vector.extract_strided_slice %242 {offsets = [0, 32], sizes = [2, 32], strides = [1, 1]} : vector<2x96xf32> to vector<2x32xf32>
    %253 = vector.extract_strided_slice %243 {offsets = [0, 32], sizes = [2, 32], strides = [1, 1]} : vector<2x96xf32> to vector<2x32xf32>
    %254 = arith.addf %252, %253 : vector<2x32xf32>
    %255 = arith.negf %254 : vector<2x32xf32>
    %256 = math.exp %255 : vector<2x32xf32>
    %cst_68 = arith.constant 1.000000e+00 : f32
    %257 = vector.broadcast %cst_68 : f32 to vector<2x32xf32>
    %258 = arith.addf %257, %256 : vector<2x32xf32>
    %259 = arith.divf %257, %258 : vector<2x32xf32>
    %260 = vector.extract_strided_slice %242 {offsets = [0, 64], sizes = [2, 32], strides = [1, 1]} : vector<2x96xf32> to vector<2x32xf32>
    %261 = vector.extract_strided_slice %243 {offsets = [0, 64], sizes = [2, 32], strides = [1, 1]} : vector<2x96xf32> to vector<2x32xf32>
    %262 = arith.addf %261, %18 : vector<2x32xf32>
    %263 = arith.mulf %251, %262 : vector<2x32xf32>
    %264 = arith.addf %260, %263 : vector<2x32xf32>
    %265 = math.tanh %264 : vector<2x32xf32>
    %cst_69 = arith.constant 1.000000e+00 : f32
    %266 = vector.broadcast %cst_69 : f32 to vector<2x32xf32>
    %267 = arith.subf %266, %259 : vector<2x32xf32>
    %268 = arith.mulf %267, %265 : vector<2x32xf32>
    %269 = arith.mulf %259, %208 : vector<2x32xf32>
    %270 = arith.addf %268, %269 : vector<2x32xf32>
    %c4 = arith.constant 4 : index
    %c0_70 = arith.constant 0 : index
    %c0_71 = arith.constant 0 : index
    %271 = vector.load %arg1[%c4, %c0_70, %c0_71] : memref<8x2x16xf32, #tpu.memory_space<vmem>>, vector<1x2x16xf32>
    %272 = vector.shape_cast %271 : vector<1x2x16xf32> to vector<2x16xf32>
    %cst_72 = arith.constant dense<0.000000e+00> : vector<2x96xf32>
    %273 = tpu.matmul %272, %3, %cst_72 {dimension_numbers = #tpu.dot_dimension_numbers<[1], [0], [0], [1], [0, 0, 1, 1], [], []>} : vector<2x16xf32>, vector<16x96xf32>, vector<2x96xf32> -> vector<2x96xf32>
    %274 = arith.addf %273, %6 : vector<2x96xf32>
    %cst_73 = arith.constant dense<0.000000e+00> : vector<2x96xf32>
    %275 = tpu.matmul %240, %7, %cst_73 {dimension_numbers = #tpu.dot_dimension_numbers<[1], [0], [0], [1], [0, 0, 1, 1], [], []>} : vector<2x32xf32>, vector<32x96xf32>, vector<2x96xf32> -> vector<2x96xf32>
    %276 = vector.extract_strided_slice %274 {offsets = [0, 0], sizes = [2, 32], strides = [1, 1]} : vector<2x96xf32> to vector<2x32xf32>
    %277 = vector.extract_strided_slice %275 {offsets = [0, 0], sizes = [2, 32], strides = [1, 1]} : vector<2x96xf32> to vector<2x32xf32>
    %278 = arith.addf %276, %277 : vector<2x32xf32>
    %279 = arith.negf %278 : vector<2x32xf32>
    %280 = math.exp %279 : vector<2x32xf32>
    %cst_74 = arith.constant 1.000000e+00 : f32
    %281 = vector.broadcast %cst_74 : f32 to vector<2x32xf32>
    %282 = arith.addf %281, %280 : vector<2x32xf32>
    %283 = arith.divf %281, %282 : vector<2x32xf32>
    %284 = vector.extract_strided_slice %274 {offsets = [0, 32], sizes = [2, 32], strides = [1, 1]} : vector<2x96xf32> to vector<2x32xf32>
    %285 = vector.extract_strided_slice %275 {offsets = [0, 32], sizes = [2, 32], strides = [1, 1]} : vector<2x96xf32> to vector<2x32xf32>
    %286 = arith.addf %284, %285 : vector<2x32xf32>
    %287 = arith.negf %286 : vector<2x32xf32>
    %288 = math.exp %287 : vector<2x32xf32>
    %cst_75 = arith.constant 1.000000e+00 : f32
    %289 = vector.broadcast %cst_75 : f32 to vector<2x32xf32>
    %290 = arith.addf %289, %288 : vector<2x32xf32>
    %291 = arith.divf %289, %290 : vector<2x32xf32>
    %292 = vector.extract_strided_slice %274 {offsets = [0, 64], sizes = [2, 32], strides = [1, 1]} : vector<2x96xf32> to vector<2x32xf32>
    %293 = vector.extract_strided_slice %275 {offsets = [0, 64], sizes = [2, 32], strides = [1, 1]} : vector<2x96xf32> to vector<2x32xf32>
    %294 = arith.addf %293, %10 : vector<2x32xf32>
    %295 = arith.mulf %283, %294 : vector<2x32xf32>
    %296 = arith.addf %292, %295 : vector<2x32xf32>
    %297 = math.tanh %296 : vector<2x32xf32>
    %cst_76 = arith.constant 1.000000e+00 : f32
    %298 = vector.broadcast %cst_76 : f32 to vector<2x32xf32>
    %299 = arith.subf %298, %291 : vector<2x32xf32>
    %300 = arith.mulf %299, %297 : vector<2x32xf32>
    %301 = arith.mulf %291, %240 : vector<2x32xf32>
    %302 = arith.addf %300, %301 : vector<2x32xf32>
    %cst_77 = arith.constant dense<0.000000e+00> : vector<2x96xf32>
    %303 = tpu.matmul %302, %11, %cst_77 {dimension_numbers = #tpu.dot_dimension_numbers<[1], [0], [0], [1], [0, 0, 1, 1], [], []>} : vector<2x32xf32>, vector<32x96xf32>, vector<2x96xf32> -> vector<2x96xf32>
    %304 = arith.addf %303, %14 : vector<2x96xf32>
    %cst_78 = arith.constant dense<0.000000e+00> : vector<2x96xf32>
    %305 = tpu.matmul %270, %15, %cst_78 {dimension_numbers = #tpu.dot_dimension_numbers<[1], [0], [0], [1], [0, 0, 1, 1], [], []>} : vector<2x32xf32>, vector<32x96xf32>, vector<2x96xf32> -> vector<2x96xf32>
    %306 = vector.extract_strided_slice %304 {offsets = [0, 0], sizes = [2, 32], strides = [1, 1]} : vector<2x96xf32> to vector<2x32xf32>
    %307 = vector.extract_strided_slice %305 {offsets = [0, 0], sizes = [2, 32], strides = [1, 1]} : vector<2x96xf32> to vector<2x32xf32>
    %308 = arith.addf %306, %307 : vector<2x32xf32>
    %309 = arith.negf %308 : vector<2x32xf32>
    %310 = math.exp %309 : vector<2x32xf32>
    %cst_79 = arith.constant 1.000000e+00 : f32
    %311 = vector.broadcast %cst_79 : f32 to vector<2x32xf32>
    %312 = arith.addf %311, %310 : vector<2x32xf32>
    %313 = arith.divf %311, %312 : vector<2x32xf32>
    %314 = vector.extract_strided_slice %304 {offsets = [0, 32], sizes = [2, 32], strides = [1, 1]} : vector<2x96xf32> to vector<2x32xf32>
    %315 = vector.extract_strided_slice %305 {offsets = [0, 32], sizes = [2, 32], strides = [1, 1]} : vector<2x96xf32> to vector<2x32xf32>
    %316 = arith.addf %314, %315 : vector<2x32xf32>
    %317 = arith.negf %316 : vector<2x32xf32>
    %318 = math.exp %317 : vector<2x32xf32>
    %cst_80 = arith.constant 1.000000e+00 : f32
    %319 = vector.broadcast %cst_80 : f32 to vector<2x32xf32>
    %320 = arith.addf %319, %318 : vector<2x32xf32>
    %321 = arith.divf %319, %320 : vector<2x32xf32>
    %322 = vector.extract_strided_slice %304 {offsets = [0, 64], sizes = [2, 32], strides = [1, 1]} : vector<2x96xf32> to vector<2x32xf32>
    %323 = vector.extract_strided_slice %305 {offsets = [0, 64], sizes = [2, 32], strides = [1, 1]} : vector<2x96xf32> to vector<2x32xf32>
    %324 = arith.addf %323, %18 : vector<2x32xf32>
    %325 = arith.mulf %313, %324 : vector<2x32xf32>
    %326 = arith.addf %322, %325 : vector<2x32xf32>
    %327 = math.tanh %326 : vector<2x32xf32>
    %cst_81 = arith.constant 1.000000e+00 : f32
    %328 = vector.broadcast %cst_81 : f32 to vector<2x32xf32>
    %329 = arith.subf %328, %321 : vector<2x32xf32>
    %330 = arith.mulf %329, %327 : vector<2x32xf32>
    %331 = arith.mulf %321, %270 : vector<2x32xf32>
    %332 = arith.addf %330, %331 : vector<2x32xf32>
    %c5 = arith.constant 5 : index
    %c0_82 = arith.constant 0 : index
    %c0_83 = arith.constant 0 : index
    %333 = vector.load %arg1[%c5, %c0_82, %c0_83] : memref<8x2x16xf32, #tpu.memory_space<vmem>>, vector<1x2x16xf32>
    %334 = vector.shape_cast %333 : vector<1x2x16xf32> to vector<2x16xf32>
    %cst_84 = arith.constant dense<0.000000e+00> : vector<2x96xf32>
    %335 = tpu.matmul %334, %3, %cst_84 {dimension_numbers = #tpu.dot_dimension_numbers<[1], [0], [0], [1], [0, 0, 1, 1], [], []>} : vector<2x16xf32>, vector<16x96xf32>, vector<2x96xf32> -> vector<2x96xf32>
    %336 = arith.addf %335, %6 : vector<2x96xf32>
    %cst_85 = arith.constant dense<0.000000e+00> : vector<2x96xf32>
    %337 = tpu.matmul %302, %7, %cst_85 {dimension_numbers = #tpu.dot_dimension_numbers<[1], [0], [0], [1], [0, 0, 1, 1], [], []>} : vector<2x32xf32>, vector<32x96xf32>, vector<2x96xf32> -> vector<2x96xf32>
    %338 = vector.extract_strided_slice %336 {offsets = [0, 0], sizes = [2, 32], strides = [1, 1]} : vector<2x96xf32> to vector<2x32xf32>
    %339 = vector.extract_strided_slice %337 {offsets = [0, 0], sizes = [2, 32], strides = [1, 1]} : vector<2x96xf32> to vector<2x32xf32>
    %340 = arith.addf %338, %339 : vector<2x32xf32>
    %341 = arith.negf %340 : vector<2x32xf32>
    %342 = math.exp %341 : vector<2x32xf32>
    %cst_86 = arith.constant 1.000000e+00 : f32
    %343 = vector.broadcast %cst_86 : f32 to vector<2x32xf32>
    %344 = arith.addf %343, %342 : vector<2x32xf32>
    %345 = arith.divf %343, %344 : vector<2x32xf32>
    %346 = vector.extract_strided_slice %336 {offsets = [0, 32], sizes = [2, 32], strides = [1, 1]} : vector<2x96xf32> to vector<2x32xf32>
    %347 = vector.extract_strided_slice %337 {offsets = [0, 32], sizes = [2, 32], strides = [1, 1]} : vector<2x96xf32> to vector<2x32xf32>
    %348 = arith.addf %346, %347 : vector<2x32xf32>
    %349 = arith.negf %348 : vector<2x32xf32>
    %350 = math.exp %349 : vector<2x32xf32>
    %cst_87 = arith.constant 1.000000e+00 : f32
    %351 = vector.broadcast %cst_87 : f32 to vector<2x32xf32>
    %352 = arith.addf %351, %350 : vector<2x32xf32>
    %353 = arith.divf %351, %352 : vector<2x32xf32>
    %354 = vector.extract_strided_slice %336 {offsets = [0, 64], sizes = [2, 32], strides = [1, 1]} : vector<2x96xf32> to vector<2x32xf32>
    %355 = vector.extract_strided_slice %337 {offsets = [0, 64], sizes = [2, 32], strides = [1, 1]} : vector<2x96xf32> to vector<2x32xf32>
    %356 = arith.addf %355, %10 : vector<2x32xf32>
    %357 = arith.mulf %345, %356 : vector<2x32xf32>
    %358 = arith.addf %354, %357 : vector<2x32xf32>
    %359 = math.tanh %358 : vector<2x32xf32>
    %cst_88 = arith.constant 1.000000e+00 : f32
    %360 = vector.broadcast %cst_88 : f32 to vector<2x32xf32>
    %361 = arith.subf %360, %353 : vector<2x32xf32>
    %362 = arith.mulf %361, %359 : vector<2x32xf32>
    %363 = arith.mulf %353, %302 : vector<2x32xf32>
    %364 = arith.addf %362, %363 : vector<2x32xf32>
    %cst_89 = arith.constant dense<0.000000e+00> : vector<2x96xf32>
    %365 = tpu.matmul %364, %11, %cst_89 {dimension_numbers = #tpu.dot_dimension_numbers<[1], [0], [0], [1], [0, 0, 1, 1], [], []>} : vector<2x32xf32>, vector<32x96xf32>, vector<2x96xf32> -> vector<2x96xf32>
    %366 = arith.addf %365, %14 : vector<2x96xf32>
    %cst_90 = arith.constant dense<0.000000e+00> : vector<2x96xf32>
    %367 = tpu.matmul %332, %15, %cst_90 {dimension_numbers = #tpu.dot_dimension_numbers<[1], [0], [0], [1], [0, 0, 1, 1], [], []>} : vector<2x32xf32>, vector<32x96xf32>, vector<2x96xf32> -> vector<2x96xf32>
    %368 = vector.extract_strided_slice %366 {offsets = [0, 0], sizes = [2, 32], strides = [1, 1]} : vector<2x96xf32> to vector<2x32xf32>
    %369 = vector.extract_strided_slice %367 {offsets = [0, 0], sizes = [2, 32], strides = [1, 1]} : vector<2x96xf32> to vector<2x32xf32>
    %370 = arith.addf %368, %369 : vector<2x32xf32>
    %371 = arith.negf %370 : vector<2x32xf32>
    %372 = math.exp %371 : vector<2x32xf32>
    %cst_91 = arith.constant 1.000000e+00 : f32
    %373 = vector.broadcast %cst_91 : f32 to vector<2x32xf32>
    %374 = arith.addf %373, %372 : vector<2x32xf32>
    %375 = arith.divf %373, %374 : vector<2x32xf32>
    %376 = vector.extract_strided_slice %366 {offsets = [0, 32], sizes = [2, 32], strides = [1, 1]} : vector<2x96xf32> to vector<2x32xf32>
    %377 = vector.extract_strided_slice %367 {offsets = [0, 32], sizes = [2, 32], strides = [1, 1]} : vector<2x96xf32> to vector<2x32xf32>
    %378 = arith.addf %376, %377 : vector<2x32xf32>
    %379 = arith.negf %378 : vector<2x32xf32>
    %380 = math.exp %379 : vector<2x32xf32>
    %cst_92 = arith.constant 1.000000e+00 : f32
    %381 = vector.broadcast %cst_92 : f32 to vector<2x32xf32>
    %382 = arith.addf %381, %380 : vector<2x32xf32>
    %383 = arith.divf %381, %382 : vector<2x32xf32>
    %384 = vector.extract_strided_slice %366 {offsets = [0, 64], sizes = [2, 32], strides = [1, 1]} : vector<2x96xf32> to vector<2x32xf32>
    %385 = vector.extract_strided_slice %367 {offsets = [0, 64], sizes = [2, 32], strides = [1, 1]} : vector<2x96xf32> to vector<2x32xf32>
    %386 = arith.addf %385, %18 : vector<2x32xf32>
    %387 = arith.mulf %375, %386 : vector<2x32xf32>
    %388 = arith.addf %384, %387 : vector<2x32xf32>
    %389 = math.tanh %388 : vector<2x32xf32>
    %cst_93 = arith.constant 1.000000e+00 : f32
    %390 = vector.broadcast %cst_93 : f32 to vector<2x32xf32>
    %391 = arith.subf %390, %383 : vector<2x32xf32>
    %392 = arith.mulf %391, %389 : vector<2x32xf32>
    %393 = arith.mulf %383, %332 : vector<2x32xf32>
    %394 = arith.addf %392, %393 : vector<2x32xf32>
    %c6 = arith.constant 6 : index
    %c0_94 = arith.constant 0 : index
    %c0_95 = arith.constant 0 : index
    %395 = vector.load %arg1[%c6, %c0_94, %c0_95] : memref<8x2x16xf32, #tpu.memory_space<vmem>>, vector<1x2x16xf32>
    %396 = vector.shape_cast %395 : vector<1x2x16xf32> to vector<2x16xf32>
    %cst_96 = arith.constant dense<0.000000e+00> : vector<2x96xf32>
    %397 = tpu.matmul %396, %3, %cst_96 {dimension_numbers = #tpu.dot_dimension_numbers<[1], [0], [0], [1], [0, 0, 1, 1], [], []>} : vector<2x16xf32>, vector<16x96xf32>, vector<2x96xf32> -> vector<2x96xf32>
    %398 = arith.addf %397, %6 : vector<2x96xf32>
    %cst_97 = arith.constant dense<0.000000e+00> : vector<2x96xf32>
    %399 = tpu.matmul %364, %7, %cst_97 {dimension_numbers = #tpu.dot_dimension_numbers<[1], [0], [0], [1], [0, 0, 1, 1], [], []>} : vector<2x32xf32>, vector<32x96xf32>, vector<2x96xf32> -> vector<2x96xf32>
    %400 = vector.extract_strided_slice %398 {offsets = [0, 0], sizes = [2, 32], strides = [1, 1]} : vector<2x96xf32> to vector<2x32xf32>
    %401 = vector.extract_strided_slice %399 {offsets = [0, 0], sizes = [2, 32], strides = [1, 1]} : vector<2x96xf32> to vector<2x32xf32>
    %402 = arith.addf %400, %401 : vector<2x32xf32>
    %403 = arith.negf %402 : vector<2x32xf32>
    %404 = math.exp %403 : vector<2x32xf32>
    %cst_98 = arith.constant 1.000000e+00 : f32
    %405 = vector.broadcast %cst_98 : f32 to vector<2x32xf32>
    %406 = arith.addf %405, %404 : vector<2x32xf32>
    %407 = arith.divf %405, %406 : vector<2x32xf32>
    %408 = vector.extract_strided_slice %398 {offsets = [0, 32], sizes = [2, 32], strides = [1, 1]} : vector<2x96xf32> to vector<2x32xf32>
    %409 = vector.extract_strided_slice %399 {offsets = [0, 32], sizes = [2, 32], strides = [1, 1]} : vector<2x96xf32> to vector<2x32xf32>
    %410 = arith.addf %408, %409 : vector<2x32xf32>
    %411 = arith.negf %410 : vector<2x32xf32>
    %412 = math.exp %411 : vector<2x32xf32>
    %cst_99 = arith.constant 1.000000e+00 : f32
    %413 = vector.broadcast %cst_99 : f32 to vector<2x32xf32>
    %414 = arith.addf %413, %412 : vector<2x32xf32>
    %415 = arith.divf %413, %414 : vector<2x32xf32>
    %416 = vector.extract_strided_slice %398 {offsets = [0, 64], sizes = [2, 32], strides = [1, 1]} : vector<2x96xf32> to vector<2x32xf32>
    %417 = vector.extract_strided_slice %399 {offsets = [0, 64], sizes = [2, 32], strides = [1, 1]} : vector<2x96xf32> to vector<2x32xf32>
    %418 = arith.addf %417, %10 : vector<2x32xf32>
    %419 = arith.mulf %407, %418 : vector<2x32xf32>
    %420 = arith.addf %416, %419 : vector<2x32xf32>
    %421 = math.tanh %420 : vector<2x32xf32>
    %cst_100 = arith.constant 1.000000e+00 : f32
    %422 = vector.broadcast %cst_100 : f32 to vector<2x32xf32>
    %423 = arith.subf %422, %415 : vector<2x32xf32>
    %424 = arith.mulf %423, %421 : vector<2x32xf32>
    %425 = arith.mulf %415, %364 : vector<2x32xf32>
    %426 = arith.addf %424, %425 : vector<2x32xf32>
    %cst_101 = arith.constant dense<0.000000e+00> : vector<2x96xf32>
    %427 = tpu.matmul %426, %11, %cst_101 {dimension_numbers = #tpu.dot_dimension_numbers<[1], [0], [0], [1], [0, 0, 1, 1], [], []>} : vector<2x32xf32>, vector<32x96xf32>, vector<2x96xf32> -> vector<2x96xf32>
    %428 = arith.addf %427, %14 : vector<2x96xf32>
    %cst_102 = arith.constant dense<0.000000e+00> : vector<2x96xf32>
    %429 = tpu.matmul %394, %15, %cst_102 {dimension_numbers = #tpu.dot_dimension_numbers<[1], [0], [0], [1], [0, 0, 1, 1], [], []>} : vector<2x32xf32>, vector<32x96xf32>, vector<2x96xf32> -> vector<2x96xf32>
    %430 = vector.extract_strided_slice %428 {offsets = [0, 0], sizes = [2, 32], strides = [1, 1]} : vector<2x96xf32> to vector<2x32xf32>
    %431 = vector.extract_strided_slice %429 {offsets = [0, 0], sizes = [2, 32], strides = [1, 1]} : vector<2x96xf32> to vector<2x32xf32>
    %432 = arith.addf %430, %431 : vector<2x32xf32>
    %433 = arith.negf %432 : vector<2x32xf32>
    %434 = math.exp %433 : vector<2x32xf32>
    %cst_103 = arith.constant 1.000000e+00 : f32
    %435 = vector.broadcast %cst_103 : f32 to vector<2x32xf32>
    %436 = arith.addf %435, %434 : vector<2x32xf32>
    %437 = arith.divf %435, %436 : vector<2x32xf32>
    %438 = vector.extract_strided_slice %428 {offsets = [0, 32], sizes = [2, 32], strides = [1, 1]} : vector<2x96xf32> to vector<2x32xf32>
    %439 = vector.extract_strided_slice %429 {offsets = [0, 32], sizes = [2, 32], strides = [1, 1]} : vector<2x96xf32> to vector<2x32xf32>
    %440 = arith.addf %438, %439 : vector<2x32xf32>
    %441 = arith.negf %440 : vector<2x32xf32>
    %442 = math.exp %441 : vector<2x32xf32>
    %cst_104 = arith.constant 1.000000e+00 : f32
    %443 = vector.broadcast %cst_104 : f32 to vector<2x32xf32>
    %444 = arith.addf %443, %442 : vector<2x32xf32>
    %445 = arith.divf %443, %444 : vector<2x32xf32>
    %446 = vector.extract_strided_slice %428 {offsets = [0, 64], sizes = [2, 32], strides = [1, 1]} : vector<2x96xf32> to vector<2x32xf32>
    %447 = vector.extract_strided_slice %429 {offsets = [0, 64], sizes = [2, 32], strides = [1, 1]} : vector<2x96xf32> to vector<2x32xf32>
    %448 = arith.addf %447, %18 : vector<2x32xf32>
    %449 = arith.mulf %437, %448 : vector<2x32xf32>
    %450 = arith.addf %446, %449 : vector<2x32xf32>
    %451 = math.tanh %450 : vector<2x32xf32>
    %cst_105 = arith.constant 1.000000e+00 : f32
    %452 = vector.broadcast %cst_105 : f32 to vector<2x32xf32>
    %453 = arith.subf %452, %445 : vector<2x32xf32>
    %454 = arith.mulf %453, %451 : vector<2x32xf32>
    %455 = arith.mulf %445, %394 : vector<2x32xf32>
    %456 = arith.addf %454, %455 : vector<2x32xf32>
    %c7 = arith.constant 7 : index
    %c0_106 = arith.constant 0 : index
    %c0_107 = arith.constant 0 : index
    %457 = vector.load %arg1[%c7, %c0_106, %c0_107] : memref<8x2x16xf32, #tpu.memory_space<vmem>>, vector<1x2x16xf32>
    %458 = vector.shape_cast %457 : vector<1x2x16xf32> to vector<2x16xf32>
    %cst_108 = arith.constant dense<0.000000e+00> : vector<2x96xf32>
    %459 = tpu.matmul %458, %3, %cst_108 {dimension_numbers = #tpu.dot_dimension_numbers<[1], [0], [0], [1], [0, 0, 1, 1], [], []>} : vector<2x16xf32>, vector<16x96xf32>, vector<2x96xf32> -> vector<2x96xf32>
    %460 = arith.addf %459, %6 : vector<2x96xf32>
    %cst_109 = arith.constant dense<0.000000e+00> : vector<2x96xf32>
    %461 = tpu.matmul %426, %7, %cst_109 {dimension_numbers = #tpu.dot_dimension_numbers<[1], [0], [0], [1], [0, 0, 1, 1], [], []>} : vector<2x32xf32>, vector<32x96xf32>, vector<2x96xf32> -> vector<2x96xf32>
    %462 = vector.extract_strided_slice %460 {offsets = [0, 0], sizes = [2, 32], strides = [1, 1]} : vector<2x96xf32> to vector<2x32xf32>
    %463 = vector.extract_strided_slice %461 {offsets = [0, 0], sizes = [2, 32], strides = [1, 1]} : vector<2x96xf32> to vector<2x32xf32>
    %464 = arith.addf %462, %463 : vector<2x32xf32>
    %465 = arith.negf %464 : vector<2x32xf32>
    %466 = math.exp %465 : vector<2x32xf32>
    %cst_110 = arith.constant 1.000000e+00 : f32
    %467 = vector.broadcast %cst_110 : f32 to vector<2x32xf32>
    %468 = arith.addf %467, %466 : vector<2x32xf32>
    %469 = arith.divf %467, %468 : vector<2x32xf32>
    %470 = vector.extract_strided_slice %460 {offsets = [0, 32], sizes = [2, 32], strides = [1, 1]} : vector<2x96xf32> to vector<2x32xf32>
    %471 = vector.extract_strided_slice %461 {offsets = [0, 32], sizes = [2, 32], strides = [1, 1]} : vector<2x96xf32> to vector<2x32xf32>
    %472 = arith.addf %470, %471 : vector<2x32xf32>
    %473 = arith.negf %472 : vector<2x32xf32>
    %474 = math.exp %473 : vector<2x32xf32>
    %cst_111 = arith.constant 1.000000e+00 : f32
    %475 = vector.broadcast %cst_111 : f32 to vector<2x32xf32>
    %476 = arith.addf %475, %474 : vector<2x32xf32>
    %477 = arith.divf %475, %476 : vector<2x32xf32>
    %478 = vector.extract_strided_slice %460 {offsets = [0, 64], sizes = [2, 32], strides = [1, 1]} : vector<2x96xf32> to vector<2x32xf32>
    %479 = vector.extract_strided_slice %461 {offsets = [0, 64], sizes = [2, 32], strides = [1, 1]} : vector<2x96xf32> to vector<2x32xf32>
    %480 = arith.addf %479, %10 : vector<2x32xf32>
    %481 = arith.mulf %469, %480 : vector<2x32xf32>
    %482 = arith.addf %478, %481 : vector<2x32xf32>
    %483 = math.tanh %482 : vector<2x32xf32>
    %cst_112 = arith.constant 1.000000e+00 : f32
    %484 = vector.broadcast %cst_112 : f32 to vector<2x32xf32>
    %485 = arith.subf %484, %477 : vector<2x32xf32>
    %486 = arith.mulf %485, %483 : vector<2x32xf32>
    %487 = arith.mulf %477, %426 : vector<2x32xf32>
    %488 = arith.addf %486, %487 : vector<2x32xf32>
    %cst_113 = arith.constant dense<0.000000e+00> : vector<2x96xf32>
    %489 = tpu.matmul %488, %11, %cst_113 {dimension_numbers = #tpu.dot_dimension_numbers<[1], [0], [0], [1], [0, 0, 1, 1], [], []>} : vector<2x32xf32>, vector<32x96xf32>, vector<2x96xf32> -> vector<2x96xf32>
    %490 = arith.addf %489, %14 : vector<2x96xf32>
    %cst_114 = arith.constant dense<0.000000e+00> : vector<2x96xf32>
    %491 = tpu.matmul %456, %15, %cst_114 {dimension_numbers = #tpu.dot_dimension_numbers<[1], [0], [0], [1], [0, 0, 1, 1], [], []>} : vector<2x32xf32>, vector<32x96xf32>, vector<2x96xf32> -> vector<2x96xf32>
    %492 = vector.extract_strided_slice %490 {offsets = [0, 0], sizes = [2, 32], strides = [1, 1]} : vector<2x96xf32> to vector<2x32xf32>
    %493 = vector.extract_strided_slice %491 {offsets = [0, 0], sizes = [2, 32], strides = [1, 1]} : vector<2x96xf32> to vector<2x32xf32>
    %494 = arith.addf %492, %493 : vector<2x32xf32>
    %495 = arith.negf %494 : vector<2x32xf32>
    %496 = math.exp %495 : vector<2x32xf32>
    %cst_115 = arith.constant 1.000000e+00 : f32
    %497 = vector.broadcast %cst_115 : f32 to vector<2x32xf32>
    %498 = arith.addf %497, %496 : vector<2x32xf32>
    %499 = arith.divf %497, %498 : vector<2x32xf32>
    %500 = vector.extract_strided_slice %490 {offsets = [0, 32], sizes = [2, 32], strides = [1, 1]} : vector<2x96xf32> to vector<2x32xf32>
    %501 = vector.extract_strided_slice %491 {offsets = [0, 32], sizes = [2, 32], strides = [1, 1]} : vector<2x96xf32> to vector<2x32xf32>
    %502 = arith.addf %500, %501 : vector<2x32xf32>
    %503 = arith.negf %502 : vector<2x32xf32>
    %504 = math.exp %503 : vector<2x32xf32>
    %cst_116 = arith.constant 1.000000e+00 : f32
    %505 = vector.broadcast %cst_116 : f32 to vector<2x32xf32>
    %506 = arith.addf %505, %504 : vector<2x32xf32>
    %507 = arith.divf %505, %506 : vector<2x32xf32>
    %508 = vector.extract_strided_slice %490 {offsets = [0, 64], sizes = [2, 32], strides = [1, 1]} : vector<2x96xf32> to vector<2x32xf32>
    %509 = vector.extract_strided_slice %491 {offsets = [0, 64], sizes = [2, 32], strides = [1, 1]} : vector<2x96xf32> to vector<2x32xf32>
    %510 = arith.addf %509, %18 : vector<2x32xf32>
    %511 = arith.mulf %499, %510 : vector<2x32xf32>
    %512 = arith.addf %508, %511 : vector<2x32xf32>
    %513 = math.tanh %512 : vector<2x32xf32>
    %cst_117 = arith.constant 1.000000e+00 : f32
    %514 = vector.broadcast %cst_117 : f32 to vector<2x32xf32>
    %515 = arith.subf %514, %507 : vector<2x32xf32>
    %516 = arith.mulf %515, %513 : vector<2x32xf32>
    %517 = arith.mulf %507, %456 : vector<2x32xf32>
    %518 = arith.addf %516, %517 : vector<2x32xf32>
    %c0_118 = arith.constant 0 : index
    %c0_119 = arith.constant 0 : index
    %c0_120 = arith.constant 0 : index
    %519 = vector.load %arg13[%c0_118, %c0_119, %c0_120] : memref<2x2x32xf32, #tpu.memory_space<vmem>>, vector<1x2x32xf32>
    %520 = vector.shape_cast %519 : vector<1x2x32xf32> to vector<2x32xf32>
    %521 = vector.shape_cast %488 : vector<2x32xf32> to vector<1x2x32xf32>
    tpu.vector_store %arg13[%c0_118, %c0_119, %c0_120], %521 {strides = array<i32>} : memref<2x2x32xf32, #tpu.memory_space<vmem>>, vector<1x2x32xf32>,
    %c1_121 = arith.constant 1 : index
    %c0_122 = arith.constant 0 : index
    %c0_123 = arith.constant 0 : index
    %522 = vector.load %arg13[%c1_121, %c0_122, %c0_123] : memref<2x2x32xf32, #tpu.memory_space<vmem>>, vector<1x2x32xf32>
    %523 = vector.shape_cast %522 : vector<1x2x32xf32> to vector<2x32xf32>
    %524 = vector.shape_cast %518 : vector<2x32xf32> to vector<1x2x32xf32>
    tpu.vector_store %arg13[%c1_121, %c0_122, %c0_123], %524 {strides = array<i32>} : memref<2x2x32xf32, #tpu.memory_space<vmem>>, vector<1x2x32xf32>,
    %c0_i32_124 = arith.constant 0 : i32
    %525 = arith.cmpi eq, %arg0, %c0_i32_124 : i32
    %526 = arith.extui %525 : i1 to i32
    %c0_i32_125 = arith.constant 0 : i32
    %527 = arith.cmpi ne, %526, %c0_i32_125 : i32
    scf.if %527 {
      %c0_126 = arith.constant 0 : index
      %c0_127 = arith.constant 0 : index
      %528 = vector.load %arg10[%c0_126, %c0_127] : memref<32x8xf32, #tpu.memory_space<vmem>>, vector<32x8xf32>
      %cst_128 = arith.constant dense<0.000000e+00> : vector<2x8xf32>
      %529 = tpu.matmul %518, %528, %cst_128 {dimension_numbers = #tpu.dot_dimension_numbers<[1], [0], [0], [1], [0, 0, 1, 1], [], []>} : vector<2x32xf32>, vector<32x8xf32>, vector<2x8xf32> -> vector<2x8xf32>
      %c0_129 = arith.constant 0 : index
      %c0_130 = arith.constant 0 : index
      %530 = vector.load %arg11[%c0_129, %c0_130] : memref<1x8xf32, #tpu.memory_space<vmem>>, vector<1x8xf32>
      %531 = vector.broadcast %530 : vector<1x8xf32> to vector<2x8xf32>
      %532 = arith.addf %529, %531 : vector<2x8xf32>
      %c0_131 = arith.constant 0 : index
      %c0_132 = arith.constant 0 : index
      %533 = vector.load %arg12[%c0_131, %c0_132] : memref<2x8xf32, #tpu.memory_space<vmem>>, vector<2x8xf32>
      tpu.vector_store %arg12[%c0_131, %c0_132], %532 {strides = array<i32>} : memref<2x8xf32, #tpu.memory_space<vmem>>, vector<2x8xf32>,
    } else {
    }
    return
  }
  func.func @transform_0(%arg0: i32) -> (i32, i32, i32) {
    %c0_i32 = arith.constant 0 : i32
    %c0_i32_0 = arith.constant 0 : i32
    %c0_i32_1 = arith.constant 0 : i32
    return %arg0, %c0_i32, %c0_i32_0 : i32, i32, i32
  }
  func.func @transform_1(%arg0: i32) -> (i32, i32) {
    %c0_i32 = arith.constant 0 : i32
    %c0_i32_0 = arith.constant 0 : i32
    %c0_i32_1 = arith.constant 0 : i32
    return %c0_i32, %c0_i32_0 : i32, i32
  }
  func.func @transform_2(%arg0: i32) -> (i32, i32) {
    %c0_i32 = arith.constant 0 : i32
    %c0_i32_0 = arith.constant 0 : i32
    %c0_i32_1 = arith.constant 0 : i32
    return %c0_i32, %c0_i32_0 : i32, i32
  }
  func.func @transform_3(%arg0: i32) -> (i32, i32) {
    %c0_i32 = arith.constant 0 : i32
    %c0_i32_0 = arith.constant 0 : i32
    %c0_i32_1 = arith.constant 0 : i32
    return %c0_i32, %c0_i32_0 : i32, i32
  }
  func.func @transform_4(%arg0: i32) -> (i32, i32) {
    %c0_i32 = arith.constant 0 : i32
    %c0_i32_0 = arith.constant 0 : i32
    %c0_i32_1 = arith.constant 0 : i32
    return %c0_i32, %c0_i32_0 : i32, i32
  }
  func.func @transform_5(%arg0: i32) -> (i32, i32) {
    %c0_i32 = arith.constant 0 : i32
    %c0_i32_0 = arith.constant 0 : i32
    %c0_i32_1 = arith.constant 0 : i32
    return %c0_i32, %c0_i32_0 : i32, i32
  }
  func.func @transform_6(%arg0: i32) -> (i32, i32) {
    %c0_i32 = arith.constant 0 : i32
    %c0_i32_0 = arith.constant 0 : i32
    %c0_i32_1 = arith.constant 0 : i32
    return %c0_i32, %c0_i32_0 : i32, i32
  }
  func.func @transform_7(%arg0: i32) -> (i32, i32) {
    %c0_i32 = arith.constant 0 : i32
    %c0_i32_0 = arith.constant 0 : i32
    %c0_i32_1 = arith.constant 0 : i32
    return %c0_i32, %c0_i32_0 : i32, i32
  }
  func.func @transform_8(%arg0: i32) -> (i32, i32) {
    %c0_i32 = arith.constant 0 : i32
    %c0_i32_0 = arith.constant 0 : i32
    %c0_i32_1 = arith.constant 0 : i32
    return %c0_i32, %c0_i32_0 : i32, i32
  }
  func.func @transform_9(%arg0: i32) -> (i32, i32) {
    %c0_i32 = arith.constant 0 : i32
    %c0_i32_0 = arith.constant 0 : i32
    %c0_i32_1 = arith.constant 0 : i32
    return %c0_i32, %c0_i32_0 : i32, i32
  }
  func.func @transform_10(%arg0: i32) -> (i32, i32) {
    %c0_i32 = arith.constant 0 : i32
    %c0_i32_0 = arith.constant 0 : i32
    %c0_i32_1 = arith.constant 0 : i32
    return %c0_i32, %c0_i32_0 : i32, i32
  }
  func.func @transform_11(%arg0: i32) -> (i32, i32) {
    %c0_i32 = arith.constant 0 : i32
    %c0_i32_0 = arith.constant 0 : i32
    %c0_i32_1 = arith.constant 0 : i32
    return %c0_i32, %c0_i32_0 : i32, i32
  }
}

</mosaic_0001>

<bundles_post_ra>
// kernel: gru_forward.1
= control target key start
LH: loop header
LB: loop body
LE: loop exit
PB: predicated region body
PF: predicated region fallthrough
CT: control target
= control target key end

     0   :  { %16 = vsyncpa [#allocation4], 0  ;;  %s4569_s0 = inlined_call_operand.vmem [shape: f32[8,2,16], index: 0, kind: input, shape index: {}]   ;;  %s4570_s1 = inlined_call_operand.hbm [shape: f32[16,96], index: 1, kind: input, shape index: {}]   ;;  %s4571_s2 = inlined_call_operand.vmem [shape: f32[1,96], index: 2, kind: input, shape index: {}]   ;;  %s4572_s3 = inlined_call_operand.vmem [shape: f32[32,96], index: 3, kind: input, shape index: {}]   ;;  %s4573_s4 = inlined_call_operand.vmem [shape: f32[1,32], index: 4, kind: input, shape index: {}]   ;;  %s4574_s5 = inlined_call_operand.vmem [shape: f32[32,96], index: 5, kind: input, shape index: {}]   ;;  %s4575_s6 = inlined_call_operand.hbm [shape: f32[1,96], index: 6, kind: input, shape index: {}]   ;;  %s4576_s7 = inlined_call_operand.vmem [shape: f32[32,96], index: 7, kind: input, shape index: {}]   ;;  %s4577_s8 = inlined_call_operand.vmem [shape: f32[1,32], index: 8, kind: input, shape index: {}]   ;;  %s4578_s9 = inlined_call_operand.vmem [shape: f32[32,8], index: 9, kind: input, shape index: {}]   ;;  %s4579_s10 = inlined_call_operand.hbm [shape: f32[1,8], index: 10, kind: input, shape index: {}]   ;;  %s4580_s11 = inlined_call_operand.hbm [shape: f32[2,8], index: 11, kind: output, shape index: {}]  }
   0x1   :  { %17 = vsyncpa [#allocation7], 0 }
   0x2   :  { %18 = vsyncpa [#allocation5], 0  ;;  %s3963_s17 = smov [#allocation6]   ;;  %s3964_s19 = smov [#allocation3]  }
   0x3   :  { %s47_s18 = sshll.u32 %s3963_s17, 4  ;;  %s26_s20 = sshll.u32 %s3964_s19, 4  ;;  %s48_s18 = int_to_ptr.vmem [resolvable:$true] %s47_s18  ;;  %s4035_s20 = int_to_ptr.vmem [resolvable:$true] %s26_s20 }
   0x4   :  { %s3869_s23 = scalar_lea.hbm %s4575_s6, 16 }
   0x5   :  { %p3870_p0 = scmp.ne.s32.totalorder %s4575_s6, %s3869_s23  ;;  %p3873_p1 = scmp.lt.u32.totalorder %s3869_s23, %s4575_s6 }
   0x7   :  { %p3875_p2 = pnand %p3873_p1, %p3870_p0 }
   0x9   :  { %3878 = shalt.err (!%p3875_p2)
}
   0xa   :  { %s3879_s28 = scalar_lea.vmem %s48_s18, 16  ;;  %s3883_s29 = scalar_lea.vmem %s48_s18, 32 }
   0xb   :  { %p3880_p3 = scmp.ne.s32.totalorder %s48_s18, %s3879_s28  ;;  %p3884_p4 = scmp.lt.s32.totalorder %s48_s18, %s48_s18 }
   0xc   :  { %p3885_p5 = scmp.lt.s32.totalorder %s3883_s29, %s3879_s28 }
   0xe   :  { %p3886_p6 = por %p3885_p5, %p3884_p4 }
  0x10   :  { %p3887_p7 = pnand %p3886_p6, %p3880_p3 }
  0x12   :  { %3890 = shalt.err (!%p3887_p7)
}
  0x13   :  { %50 = dma.hbm_to_vmem [thread:$0]  %s4575_s6, 16, %s48_s18, [#allocation7]  }
  0x14   :  { %s3891_s15 = scalar_lea.hbm %s4570_s1, 256 }
  0x15   :  { %p3892_p8 = scmp.ne.s32.totalorder %s4570_s1, %s3891_s15  ;;  %p3895_p9 = scmp.lt.u32.totalorder %s3891_s15, %s4570_s1 }
  0x17   :  { %p3897_p10 = pnand %p3895_p9, %p3892_p8 }
  0x19   :  { %3900 = shalt.err (!%p3897_p10)
}
  0x1a   :  { %s3901_s22 = scalar_lea.vmem %s4035_s20, 256  ;;  %p3906_p12 = scmp.lt.s32.totalorder %s4035_s20, %s4035_s20 }
  0x1b   :  { %p3902_p11 = scmp.ne.s32.totalorder %s4035_s20, %s3901_s22  ;;  %p3907_p13 = scmp.lt.s32.totalorder %s3901_s22, %s3901_s22 }
  0x1d   :  { %p3908_p0 = por %p3907_p13, %p3906_p12 }
  0x1f   :  { %p3909_p1 = pnand %p3908_p0, %p3902_p11 }
  0x21   :  { %3912 = shalt.err (!%p3909_p1)
}
  0x22   :  { %s3965_s6 = smov 128   ;;  %s3966_s18 = smov 8  }
  0x23   :  { %32 = dma.hbm_to_vmem [thread:$0]  %s4570_s1, 256, %s4035_s20, [#allocation4], %s3965_s6, %s3965_s6, %s3966_s18  }
  0x24   :  { %s3967_s25 = smov [#allocation8]   ;;  %s3913_s29 = scalar_lea.hbm %s4579_s10, 16 }
  0x25   :  { %s63_s26 = sshll.u32 %s3967_s25, 4  ;;  %p3914_p2 = scmp.ne.s32.totalorder %s4579_s10, %s3913_s29  ;;  %s64_s26 = int_to_ptr.vmem [resolvable:$true] %s63_s26 }
  0x26   :  { %p3917_p3 = scmp.lt.u32.totalorder %s3913_s29, %s4579_s10 }
  0x28   :  { %p3919_p4 = pnand %p3917_p3, %p3914_p2 }
  0x2a   :  { %3922 = shalt.err (!%p3919_p4)
}
  0x2b   :  { %s3923_s15 = scalar_lea.vmem %s64_s26, 16  ;;  %s3927_s1 = scalar_lea.vmem %s64_s26, 32 }
  0x2c   :  { %p3924_p5 = scmp.ne.s32.totalorder %s64_s26, %s3923_s15  ;;  %p3928_p6 = scmp.lt.s32.totalorder %s64_s26, %s64_s26 }
  0x2d   :  { %p3929_p7 = scmp.lt.s32.totalorder %s3927_s1, %s3923_s15 }
  0x2f   :  { %p3930_p8 = por %p3929_p7, %p3928_p6 }
  0x31   :  { %p3931_p9 = pnand %p3930_p8, %p3924_p5 }
  0x33   :  { %3934 = shalt.err (!%p3931_p9)
}
  0x34   :  { %66 = dma.hbm_to_vmem [thread:$0]  %s4579_s10, 16, %s64_s26, [#allocation7]  }
  0x35   :  { %3957 = dma.done.wait [#allocation4], 256  }
  0x36   :  { %3958 = vsyncadd [#allocation4], 4294967040 }
  0x37   :  { %3959 = dma.done.wait [#allocation7], 32  }
  0x38   :  { %3960 = vsyncadd [#allocation7], 4294967264  ;;  %v3968_v0 = vmov 0.0|0.0   ;;  %vm80_vm0 = vcmask 254976   ;;  %vm3969_vm1 = vmmov 0   ;;  %v3970_v1 = vmov 0.0  }
  0x39   :  { %3588 = vmatprep.subr.bf16.mxu1 %v3968_v0  ;;  %3585 = vmatprep.subr.bf16.mxu0 %v3968_v0  ;;  %81 = vst.msk [vmem:[#allocation2] sm:$0x3] %vm80_vm0, %v3970_v1  ;;  %82 = vst.msk [vmem:[#allocation2 + $0x2] sm:$0x3] %vm80_vm0, %v3970_v1  ;;  %v92_v2 = vld [vmem:[%s4572_s3] sm:$0xff]  ;;  %v93_v3 = vld [vmem:[%s4572_s3 + $0x8] sm:$0xff] }
  0x3a   :  { %3258 = vmatprep.mubr.msk.f32.mxu0 %vm3969_vm1, %v3970_v1  ;;  %3269 = vmatprep.mubr.msk.f32.mxu1 %vm3969_vm1, %v3970_v1  ;;  %v83_v4 = vld [vmem:[#allocation3] sm:$0xff]  ;;  %v4094_v5 = vpack.c.bf16 %v93_v3, %v92_v2  ;;  %v84_v6 = vld [vmem:[#allocation3 + $0x8] sm:$0xff]  ;;  %v95_v8 = vld [vmem:[%s4572_s3 + $0x18] sm:$0xff]  ;;  %s3971_s26 = smov 64   ;;  %vm127_vm2 = vcmask 130048   ;;  %vm201_vm3 = vcmask 261120  }
  0x3b   :  { %v94_v7 = vld [vmem:[%s4572_s3 + $0x10] sm:$0xff]  ;;  %v4102_v9 = vpack.c.bf16 %v84_v6, %v83_v4  ;;  %v3045_v10 = vld [vmem:[%s4573_s4] ss:$0 sm:$0xff]  ;;  %s3972_s3 = smov 32   ;;  %v114_v32 = vld [vmem:[%s4576_s7 + $0x8] sm:$0xff]  ;;  %vm3026_vm4 = vcmask 58368  }
  0x3c   :  { %3590 = vmatpush3.bf16.msra.mxu1 %v4094_v5  ;;  %v4108_v11 = vpack.c.bf16 %v95_v8, %v94_v7  ;;  %282 = vrot.lane.b32.xlu0 %v3045_v10, %s3971_s26  ;;  %v126_v12 = vld [vmem:[%s4569_s0] sm:$0x3]  ;;  %v115_v33 = vld [vmem:[%s4576_s7 + $0x10] sm:$0xff]  ;;  %v116_v35 = vld [vmem:[%s4576_s7 + $0x18] sm:$0xff] }
  0x3d   :  { %3587 = vmatpush3.bf16.msra.mxu0 %v4102_v9  ;;  %3591 = vmatprep.subr.bf16.mxu1 %v3968_v0  ;;  %v4133_v20 = vld [vmem:[%s4571_s2] ss:$0 sm:$0xff]  ;;  %v103_v37 = vld [vmem:[%s4574_s5 + $0x8] sm:$0xff]  ;;  %v104_v38 = vld [vmem:[%s4574_s5 + $0x10] sm:$0xff]  ;;  %v4164_v40 = vpack.c.bf16 %v116_v35, %v115_v33 }
  0x3e   :  { %3594 = vmatprep.subr.bf16.mxu0 %v3968_v0  ;;  %v113_v31 = vld [vmem:[%s4576_s7] sm:$0xff]  ;;  %v105_v39 = vld [vmem:[%s4574_s5 + $0x18] sm:$0xff]  ;;  %v4222_v58 = vld [vmem:[#allocation6] ss:$0 sm:$0xff] }
  0x3f   :  { %v4146_v34 = vpack.c.bf16 %v114_v32, %v113_v31  ;;  %v102_v36 = vld [vmem:[%s4574_s5] sm:$0xff]  ;;  %v4170_v42 = vpack.c.bf16 %v105_v39, %v104_v38  ;;  %s3973_s5 = smov 96  }
  0x40   :  { %3593 = vmatpush3.bf16.msra.mxu1 %v4108_v11  ;;  %3259 = vmatmul.mubr.msk.f32.vlgmr.msra.gmra.mrb[0].mxu0 %vm127_vm2, %v126_v12  ;;  %v123_v13 = vld [vmem:[#allocation2] sm:$0x3]  ;;  %v4166_v41 = vpack.c.bf16 %v103_v37, %v102_v36  ;;  %v4174_v43 = vld [vmem:[#allocation2 + $0x2] sm:$0x3] }
  0x41   :  { %3600 = vmatprep.subr.bf16.mxu1 %v3968_v0  ;;  %3280 = vmatprep.mubr.msk.f32.mxu0 %vm3969_vm1, %v3970_v1  ;;  %v3047_v50 = vld [vmem:[%s4577_s8] ss:$0 sm:$0xff]  ;;  %v3054_v57 = vld [vmem:[%s4569_s0 + $0x2] sm:$0x3] }
  0x42   :  { %3596 = vmatpush3.bf16.msra.mxu0 %v4166_v41 }
  0x43   :  { %3270 = vmatmul.mubr.msk.f32.vlgmr.msra.gmra.mrb[0].mxu1 %vm201_vm3, %v123_v13  ;;  %3597 = vmatprep.subr.bf16.mxu0 %v3968_v0 }
  0x44   :  { %3291 = vmatprep.mubr.msk.f32.mxu1 %vm3969_vm1, %v3970_v1  ;;  %3602 = vmatpush3.bf16.msra.mxu1 %v4146_v34 }
  0x45   :  { %3603 = vmatprep.subr.bf16.mxu1 %v3968_v0 }
  0x46   :  { %3599 = vmatpush3.bf16.msra.mxu0 %v4170_v42 }
  0x47   :  { %3606 = vmatprep.subr.bf16.mxu0 %v3968_v0 }
  0x48   :  { %3605 = vmatpush3.bf16.msra.mxu1 %v4164_v40 }
  0x49   :  { %3615 = vmatprep.subr.bf16.mxu1 %v3968_v0 }
  0x4b   :  { %3292 = vmatmul.mubr.msk.f32.vlgmr.msra.gmra.mrb[2].mxu1 %vm201_vm3, %v4174_v43 }
  0x4c   :  { %3617 = vmatpush3.bf16.msra.mxu1 %v4166_v41  ;;  %3320 = vmatprep.mubr.msk.f32.mxu1 %vm3969_vm1, %v3970_v1 }
  0x4d   :  { %3618 = vmatprep.subr.bf16.mxu1 %v3968_v0 }
  0x50   :  { %3620 = vmatpush3.bf16.msra.mxu1 %v4170_v42 }
  0x51   :  { %3627 = vmatprep.subr.bf16.mxu1 %v3968_v0 }
  0xae   :  { %v4125_v15 = vpop.permute.xlu0 %282 }
 0x113   :  { %v197_v14 = vpop.f32.mrb[0].mxu0 }
 0x114   :  { %v3260_v16 = vpop.f32.mrb[1].mxu0  ;;  %v198_v21 = vadd.f32 %v4133_v20, %v197_v14 }
 0x116   :  { %v271_v17 = vpop.f32.mrb[0].mxu1 }
 0x117   :  { %v285_v18 = vadd.f32 %v4125_v15, %v271_v17  ;;  %v3271_v19 = vpop.f32.mrb[1].mxu1  ;;  %v275_v22 = vadd.f32 %v271_v17, %v198_v21 }
 0x119   :  { %287 = vrot.lane.b32.xlu0 %v285_v18, %s3971_s26  ;;  %v3050_v23 = vmul.f32 -1.442695, %v275_v22 }
 0x11b   :  { %3771 = vpow2.f32 %v3050_v23 }
 0x11d   :  { %303 = vrot.lane.b32.xlu0 %v123_v13, %s3972_s3 }
 0x11e   :  { %v452_v52 = vpop.f32.mrb[2].mxu1 }
 0x11f   :  { %v3293_v53 = vpop.f32.mrb[3].mxu1 }
 0x121   :  { %463 = vrot.lane.b32.xlu0 %v3047_v50, %s3971_s26 }
 0x125   :  { %v3772_v24 = vpop.eup %3771 }
 0x126   :  { %v279_v25 = vadd.f32 1.0, %v3772_v24 }
 0x128   :  { %3773 = vrcp.f32 %v279_v25 }
 0x132   :  { %v3774_v26 = vpop.eup %3773 }
 0x133   :  { %v297_v46 = vsub.f32 1.0, %v3774_v26 }
 0x18b   :  { %v288_v27 = vpop.permute.xlu0 %287 }
 0x18c   :  { %v290_v28 = vmul.f32 %v3774_v26, %v288_v27 }
 0x18e   :  { %292 = vrot.lane.b32.xlu1 %v290_v28, %s3971_s26 }
 0x18f   :  { %v304_v45 = vpop.permute.xlu0 %303 }
 0x190   :  { %v306_v48 = vmul.f32 %v3774_v26, %v304_v45 }
 0x193   :  { %v4196_v54 = vpop.permute.xlu0 %463 }
 0x194   :  { %v466_v55 = vadd.f32 %v4196_v54, %v452_v52 }
 0x196   :  { %468 = vrot.lane.b32.xlu0 %v466_v55, %s3971_s26 }
 0x200   :  { %v293_v29 = vpop.permute.xlu1 %292 }
 0x201   :  { %v295_v30 = vadd.f32 %v293_v29, %v198_v21 }
 0x203   :  { %3775 = vtanh.f32 %v295_v30 }
 0x208   :  { %v469_v12 = vpop.permute.xlu0 %468 }
 0x20d   :  { %v3776_v44 = vpop.eup %3775 }
 0x20e   :  { %299 = vrot.lane.b32.xlu1 %v3776_v44, %s3973_s5 }
 0x280   :  { %v300_v47 = vpop.permute.xlu1 %299 }
 0x281   :  { %v302_v49 = vmul.f32 %v300_v47, %v297_v46  ;;  %v3061_v47 = vld [vmem:[%s4569_s0 + $0x4] sm:$0x3] }
 0x283   :  { %v4192_v51 = vadd.f32 %v306_v48, %v302_v49 }
 0x285   :  { %309 = vrot.lane.b32.xlu1 %v4192_v51, %s3973_s5 }
 0x2f7   :  { %v310_v56 = vpop.permute.xlu1 %309 }
 0x2f8   :  { %3281 = vmatmul.mubr.msk.f32.vlgmr.msra.gmra.mrb[2].mxu0 %vm201_vm3, %v310_v56 }
 0x2f9   :  { %3608 = vmatpush3.bf16.msra.mxu0 %v4102_v9  ;;  %3298 = vmatprep.mubr.msk.f32.mxu0 %vm3969_vm1, %v3970_v1 }
 0x2fa   :  { %3609 = vmatprep.subr.bf16.mxu0 %v3968_v0 }
 0x2fc   :  { %3299 = vmatmul.mubr.msk.f32.vlgmr.msra.gmra.mrb[4].mxu0 %vm127_vm2, %v3054_v57 }
 0x2fd   :  { %3611 = vmatpush3.bf16.msra.mxu0 %v4094_v5  ;;  %3309 = vmatprep.mubr.msk.f32.mxu0 %vm3969_vm1, %v3970_v1 }
 0x2fe   :  { %3612 = vmatprep.subr.bf16.mxu0 %v3968_v0 }
 0x301   :  { %3614 = vmatpush3.bf16.msra.mxu0 %v4108_v11 }
 0x302   :  { %3621 = vmatprep.subr.bf16.mxu0 %v3968_v0 }
 0x304   :  { %3310 = vmatmul.mubr.msk.f32.vlgmr.msra.gmra.mrb[6].mxu0 %vm201_vm3, %v310_v56 }
 0x305   :  { %3623 = vmatpush3.bf16.msra.mxu0 %v4146_v34  ;;  %3331 = vmatprep.mubr.msk.f32.mxu0 %vm3969_vm1, %v3970_v1 }
 0x306   :  { %3624 = vmatprep.subr.bf16.mxu0 %v3968_v0 }
 0x309   :  { %3626 = vmatpush3.bf16.msra.mxu0 %v4164_v40 }
 0x30a   :  { %3636 = vmatprep.subr.bf16.mxu0 %v3968_v0 }
 0x3cb   :  { %v379_v59 = vpop.f32.mrb[2].mxu0 }
 0x3cc   :  { %v380_v60 = vadd.f32 %v4222_v58, %v379_v59  ;;  %v3282_v61 = vpop.f32.mrb[3].mxu0 }
 0x3ce   :  { %v456_v62 = vadd.f32 %v452_v52, %v380_v60 }
 0x3cf   :  { %v560_v63 = vpop.f32.mrb[4].mxu0 }
 0x3d0   :  { %v3053_v2 = vmul.f32 -1.442695, %v456_v62  ;;  %v3300_v3 = vpop.f32.mrb[5].mxu0  ;;  %v561_v16 = vadd.f32 %v4133_v20, %v560_v63 }
 0x3d2   :  { %3777 = vpow2.f32 %v3053_v2 }
 0x3d7   :  { %v630_v4 = vpop.f32.mrb[6].mxu0 }
 0x3d8   :  { %v641_v6 = vadd.f32 %v630_v4, %v4125_v15  ;;  %v3311_v7 = vpop.f32.mrb[7].mxu0  ;;  %v634_v17 = vadd.f32 %v630_v4, %v561_v16 }
 0x3da   :  { %643 = vrot.lane.b32.xlu1 %v641_v6, %s3971_s26  ;;  %v3057_v18 = vmul.f32 -1.442695, %v634_v17 }
 0x3dc   :  { %v3778_v8 = vpop.eup %3777 }
 0x3dd   :  { %v460_v10 = vadd.f32 1.0, %v3778_v8 }
 0x3df   :  { %3779 = vrcp.f32 %v460_v10 }
 0x3e0   :  { %3781 = vpow2.f32 %v3057_v18 }
 0x3e9   :  { %v3780_v13 = vpop.eup %3779 }
 0x3ea   :  { %v471_v14 = vmul.f32 %v3780_v13, %v469_v12  ;;  %v3782_v19 = vpop.eup %3781  ;;  %v478_v37 = vsub.f32 1.0, %v3780_v13 }
 0x3eb   :  { %v638_v21 = vadd.f32 1.0, %v3782_v19 }
 0x3ec   :  { %473 = vrot.lane.b32.xlu0 %v471_v14, %s3971_s26 }
 0x3ed   :  { %3783 = vrcp.f32 %v638_v21 }
 0x3f7   :  { %v3784_v22 = vpop.eup %3783 }
 0x3f8   :  { %v653_v31 = vsub.f32 1.0, %v3784_v22  ;;  %v659_v33 = vmul.f32 %v3784_v22, %v4192_v51 }
 0x44c   :  { %v644_v23 = vpop.permute.xlu1 %643 }
 0x44d   :  { %v646_v24 = vmul.f32 %v3784_v22, %v644_v23 }
 0x44f   :  { %648 = vrot.lane.b32.xlu1 %v646_v24, %s3971_s26 }
 0x45e   :  { %v474_v25 = vpop.permute.xlu0 %473 }
 0x45f   :  { %v476_v26 = vadd.f32 %v474_v25, %v380_v60 }
 0x461   :  { %3785 = vtanh.f32 %v476_v26 }
 0x46b   :  { %v3786_v27 = vpop.eup %3785 }
 0x46c   :  { %480 = vrot.lane.b32.xlu0 %v3786_v27, %s3973_s5 }
 0x4c1   :  { %v649_v28 = vpop.permute.xlu1 %648 }
 0x4c2   :  { %v651_v29 = vadd.f32 %v649_v28, %v561_v16 }
 0x4c4   :  { %3787 = vtanh.f32 %v651_v29 }
 0x4ce   :  { %v3788_v30 = vpop.eup %3787 }
 0x4cf   :  { %655 = vrot.lane.b32.xlu1 %v3788_v30, %s3973_s5 }
 0x4d3   :  { %484 = vrot.lane.b32.xlu1 %v4174_v43, %s3972_s3 }
 0x4de   :  { %v481_v36 = vpop.permute.xlu0 %480 }
 0x4df   :  { %v483_v44 = vmul.f32 %v481_v36, %v478_v37 }
 0x541   :  { %v656_v32 = vpop.permute.xlu1 %655 }
 0x542   :  { %v658_v35 = vmul.f32 %v656_v32, %v653_v31 }
 0x544   :  { %v4235_v38 = vadd.f32 %v659_v33, %v658_v35 }
 0x545   :  { %v485_v39 = vpop.permute.xlu1 %484 }
 0x546   :  { %v487_v45 = vmul.f32 %v3780_v13, %v485_v39  ;;  %662 = vrot.lane.b32.xlu0 %v4235_v38, %s3973_s5  ;;  %v3068_v39 = vld [vmem:[%s4569_s0 + $0x6] sm:$0x3] }
 0x548   :  { %v4239_v46 = vadd.f32 %v487_v45, %v483_v44 }
 0x54a   :  { %737 = vrot.lane.b32.xlu1 %v4239_v46, %s3973_s5 }
 0x5b8   :  { %v663_v43 = vpop.permute.xlu0 %662 }
 0x5b9   :  { %3321 = vmatmul.mubr.msk.f32.vlgmr.msra.gmra.mrb[4].mxu1 %vm201_vm3, %v663_v43 }
 0x5ba   :  { %3629 = vmatpush3.bf16.msra.mxu1 %v4102_v9  ;;  %3338 = vmatprep.mubr.msk.f32.mxu1 %vm3969_vm1, %v3970_v1 }
 0x5bb   :  { %3630 = vmatprep.subr.bf16.mxu1 %v3968_v0 }
 0x5bc   :  { %v738_v48 = vpop.permute.xlu1 %737 }
 0x5bd   :  { %3332 = vmatmul.mubr.msk.f32.vlgmr.msra.gmra.mrb[8].mxu0 %vm201_vm3, %v738_v48  ;;  %3339 = vmatmul.mubr.msk.f32.vlgmr.msra.gmra.mrb[6].mxu1 %vm127_vm2, %v3061_v47 }
 0x5be   :  { %3632 = vmatpush3.bf16.msra.mxu1 %v4094_v5  ;;  %3349 = vmatprep.mubr.msk.f32.mxu1 %vm3969_vm1, %v3970_v1 }
 0x5bf   :  { %3633 = vmatprep.subr.bf16.mxu1 %v3968_v0  ;;  %3638 = vmatpush3.bf16.msra.mxu0 %v4166_v41 }
 0x5c0   :  { %3639 = vmatprep.subr.bf16.mxu0 %v3968_v0  ;;  %3360 = vmatprep.mubr.msk.f32.mxu0 %vm3969_vm1, %v3970_v1 }
 0x5c2   :  { %3635 = vmatpush3.bf16.msra.mxu1 %v4108_v11 }
 0x5c3   :  { %3642 = vmatprep.subr.bf16.mxu1 %v3968_v0  ;;  %3641 = vmatpush3.bf16.msra.mxu0 %v4170_v42 }
 0x5c4   :  { %3648 = vmatprep.subr.bf16.mxu0 %v3968_v0 }
 0x5c5   :  { %3350 = vmatmul.mubr.msk.f32.vlgmr.msra.gmra.mrb[8].mxu1 %vm201_vm3, %v663_v43 }
 0x5c6   :  { %3644 = vmatpush3.bf16.msra.mxu1 %v4146_v34  ;;  %3371 = vmatprep.mubr.msk.f32.mxu1 %vm3969_vm1, %v3970_v1 }
 0x5c7   :  { %3645 = vmatprep.subr.bf16.mxu1 %v3968_v0 }
 0x5ca   :  { %3647 = vmatpush3.bf16.msra.mxu1 %v4164_v40 }
 0x5cb   :  { %3657 = vmatprep.subr.bf16.mxu1 %v3968_v0 }
 0x68c   :  { %v732_v49 = vpop.f32.mrb[4].mxu1 }
 0x68d   :  { %v3322_v50 = vpop.f32.mrb[5].mxu1  ;;  %v733_v61 = vadd.f32 %v4222_v58, %v732_v49 }
 0x690   :  { %v807_v51 = vpop.f32.mrb[8].mxu0  ;;  %v909_v52 = vpop.f32.mrb[6].mxu1 }
 0x691   :  { %v818_v53 = vadd.f32 %v807_v51, %v4196_v54  ;;  %v3333_v55 = vpop.f32.mrb[9].mxu0  ;;  %v3340_v56 = vpop.f32.mrb[7].mxu1  ;;  %v811_v62 = vadd.f32 %v807_v51, %v733_v61  ;;  %v910_v2 = vadd.f32 %v4133_v20, %v909_v52 }
 0x693   :  { %820 = vrot.lane.b32.xlu1 %v818_v53, %s3971_s26  ;;  %v3060_v63 = vmul.f32 -1.442695, %v811_v62 }
 0x695   :  { %3789 = vpow2.f32 %v3060_v63 }
 0x698   :  { %v979_v57 = vpop.f32.mrb[8].mxu1 }
 0x699   :  { %v990_v59 = vadd.f32 %v979_v57, %v4125_v15  ;;  %v3351_v60 = vpop.f32.mrb[9].mxu1  ;;  %v983_v3 = vadd.f32 %v979_v57, %v910_v2 }
 0x69b   :  { %992 = vrot.lane.b32.xlu0 %v990_v59, %s3971_s26  ;;  %v3064_v4 = vmul.f32 -1.442695, %v983_v3 }
 0x69d   :  { %3791 = vpow2.f32 %v3064_v4 }
 0x69f   :  { %v3790_v6 = vpop.eup %3789 }
 0x6a0   :  { %v815_v7 = vadd.f32 1.0, %v3790_v6 }
 0x6a2   :  { %3793 = vrcp.f32 %v815_v7 }
 0x6a7   :  { %v3792_v8 = vpop.eup %3791 }
 0x6a8   :  { %v987_v10 = vadd.f32 1.0, %v3792_v8 }
 0x6aa   :  { %3795 = vrcp.f32 %v987_v10 }
 0x6ac   :  { %v3794_v12 = vpop.eup %3793 }
 0x6ad   :  { %v830_v26 = vsub.f32 1.0, %v3794_v12  ;;  %v836_v28 = vmul.f32 %v3794_v12, %v4239_v46 }
 0x6b4   :  { %v3796_v16 = vpop.eup %3795 }
 0x6b5   :  { %v1002_v31 = vsub.f32 1.0, %v3796_v16  ;;  %v1008_v33 = vmul.f32 %v3796_v16, %v4235_v38 }
 0x705   :  { %v821_v13 = vpop.permute.xlu1 %820 }
 0x706   :  { %v823_v14 = vmul.f32 %v3794_v12, %v821_v13 }
 0x708   :  { %825 = vrot.lane.b32.xlu1 %v823_v14, %s3971_s26 }
 0x70d   :  { %v993_v17 = vpop.permute.xlu0 %992 }
 0x70e   :  { %v995_v18 = vmul.f32 %v3796_v16, %v993_v17 }
 0x710   :  { %997 = vrot.lane.b32.xlu0 %v995_v18, %s3971_s26 }
 0x77a   :  { %v826_v19 = vpop.permute.xlu1 %825 }
 0x77b   :  { %v828_v21 = vadd.f32 %v826_v19, %v733_v61 }
 0x77d   :  { %3797 = vtanh.f32 %v828_v21 }
 0x782   :  { %v998_v22 = vpop.permute.xlu0 %997 }
 0x783   :  { %v1000_v23 = vadd.f32 %v998_v22, %v910_v2 }
 0x785   :  { %3799 = vtanh.f32 %v1000_v23 }
 0x787   :  { %v3798_v24 = vpop.eup %3797 }
 0x788   :  { %832 = vrot.lane.b32.xlu1 %v3798_v24, %s3973_s5 }
 0x78f   :  { %v3800_v25 = vpop.eup %3799 }
 0x790   :  { %1004 = vrot.lane.b32.xlu0 %v3800_v25, %s3973_s5 }
 0x7fa   :  { %v833_v27 = vpop.permute.xlu1 %832 }
 0x7fb   :  { %v835_v29 = vmul.f32 %v833_v27, %v830_v26 }
 0x7fd   :  { %v4283_v30 = vadd.f32 %v836_v28, %v835_v29 }
 0x7ff   :  { %1086 = vrot.lane.b32.xlu1 %v4283_v30, %s3973_s5 }
 0x802   :  { %v1005_v32 = vpop.permute.xlu0 %1004 }
 0x803   :  { %v1007_v35 = vmul.f32 %v1005_v32, %v1002_v31  ;;  %v3075_v32 = vld [vmem:[%s4569_s0 + $0x8] sm:$0x3] }
 0x805   :  { %v4288_v36 = vadd.f32 %v1008_v33, %v1007_v35 }
 0x807   :  { %1011 = vrot.lane.b32.xlu0 %v4288_v36, %s3973_s5 }
 0x871   :  { %v1087_v37 = vpop.permute.xlu1 %1086 }
 0x872   :  { %3372 = vmatmul.mubr.msk.f32.vlgmr.msra.gmra.mrb[10].mxu1 %vm201_vm3, %v1087_v37 }
 0x873   :  { %3659 = vmatpush3.bf16.msra.mxu1 %v4166_v41  ;;  %3400 = vmatprep.mubr.msk.f32.mxu1 %vm3969_vm1, %v3970_v1 }
 0x874   :  { %3660 = vmatprep.subr.bf16.mxu1 %v3968_v0 }
 0x877   :  { %3662 = vmatpush3.bf16.msra.mxu1 %v4170_v42 }
 0x878   :  { %3669 = vmatprep.subr.bf16.mxu1 %v3968_v0 }
 0x879   :  { %v1012_v38 = vpop.permute.xlu0 %1011 }
 0x87a   :  { %3361 = vmatmul.mubr.msk.f32.vlgmr.msra.gmra.mrb[10].mxu0 %vm201_vm3, %v1012_v38 }
 0x87b   :  { %3650 = vmatpush3.bf16.msra.mxu0 %v4102_v9  ;;  %3378 = vmatprep.mubr.msk.f32.mxu0 %vm3969_vm1, %v3970_v1 }
 0x87c   :  { %3651 = vmatprep.subr.bf16.mxu0 %v3968_v0 }
 0x87e   :  { %3379 = vmatmul.mubr.msk.f32.vlgmr.msra.gmra.mrb[12].mxu0 %vm127_vm2, %v3068_v39 }
 0x87f   :  { %3653 = vmatpush3.bf16.msra.mxu0 %v4094_v5  ;;  %3389 = vmatprep.mubr.msk.f32.mxu0 %vm3969_vm1, %v3970_v1 }
 0x880   :  { %3654 = vmatprep.subr.bf16.mxu0 %v3968_v0 }
 0x883   :  { %3656 = vmatpush3.bf16.msra.mxu0 %v4108_v11 }
 0x884   :  { %3663 = vmatprep.subr.bf16.mxu0 %v3968_v0 }
 0x886   :  { %3390 = vmatmul.mubr.msk.f32.vlgmr.msra.gmra.mrb[14].mxu0 %vm201_vm3, %v1012_v38 }
 0x887   :  { %3665 = vmatpush3.bf16.msra.mxu0 %v4146_v34  ;;  %3411 = vmatprep.mubr.msk.f32.mxu0 %vm3969_vm1, %v3970_v1 }
 0x888   :  { %3666 = vmatprep.subr.bf16.mxu0 %v3968_v0 }
 0x88b   :  { %3668 = vmatpush3.bf16.msra.mxu0 %v4164_v40 }
 0x88c   :  { %3678 = vmatprep.subr.bf16.mxu0 %v3968_v0 }
 0x945   :  { %v1156_v44 = vpop.f32.mrb[10].mxu1 }
 0x946   :  { %v1167_v45 = vadd.f32 %v1156_v44, %v4196_v54  ;;  %v3373_v46 = vpop.f32.mrb[11].mxu1 }
 0x948   :  { %1169 = vrot.lane.b32.xlu1 %v1167_v45, %s3971_s26 }
 0x94d   :  { %v1081_v43 = vpop.f32.mrb[10].mxu0 }
 0x94e   :  { %v3362_v47 = vpop.f32.mrb[11].mxu0  ;;  %v1082_v53 = vadd.f32 %v4222_v58, %v1081_v43 }
 0x950   :  { %v1160_v55 = vadd.f32 %v1156_v44, %v1082_v53 }
 0x951   :  { %v1258_v48 = vpop.f32.mrb[12].mxu0 }
 0x952   :  { %v3380_v49 = vpop.f32.mrb[13].mxu0  ;;  %v3067_v56 = vmul.f32 -1.442695, %v1160_v55  ;;  %v1259_v57 = vadd.f32 %v4133_v20, %v1258_v48 }
 0x954   :  { %3801 = vpow2.f32 %v3067_v56 }
 0x959   :  { %v1328_v50 = vpop.f32.mrb[14].mxu0 }
 0x95a   :  { %v1339_v51 = vadd.f32 %v1328_v50, %v4125_v15  ;;  %v3391_v52 = vpop.f32.mrb[15].mxu0  ;;  %v1332_v60 = vadd.f32 %v1328_v50, %v1259_v57 }
 0x95c   :  { %1341 = vrot.lane.b32.xlu0 %v1339_v51, %s3971_s26  ;;  %v3071_v62 = vmul.f32 -1.442695, %v1332_v60 }
 0x95e   :  { %v3802_v59 = vpop.eup %3801 }
 0x95f   :  { %v1164_v61 = vadd.f32 1.0, %v3802_v59 }
 0x961   :  { %3803 = vrcp.f32 %v1164_v61 }
 0x962   :  { %3805 = vpow2.f32 %v3071_v62 }
 0x96b   :  { %v3804_v63 = vpop.eup %3803 }
 0x96c   :  { %v3806_v4 = vpop.eup %3805  ;;  %v1179_v19 = vsub.f32 1.0, %v3804_v63  ;;  %v1185_v22 = vmul.f32 %v3804_v63, %v4283_v30 }
 0x96d   :  { %v1336_v6 = vadd.f32 1.0, %v3806_v4 }
 0x96f   :  { %3807 = vrcp.f32 %v1336_v6 }
 0x979   :  { %v3808_v7 = vpop.eup %3807 }
 0x97a   :  { %v1351_v25 = vsub.f32 1.0, %v3808_v7  ;;  %v1357_v27 = vmul.f32 %v3808_v7, %v4288_v36 }
 0x9ba   :  { %v1170_v2 = vpop.permute.xlu1 %1169 }
 0x9bb   :  { %v1172_v3 = vmul.f32 %v3804_v63, %v1170_v2 }
 0x9bd   :  { %1174 = vrot.lane.b32.xlu1 %v1172_v3, %s3971_s26 }
 0x9ce   :  { %v1342_v8 = vpop.permute.xlu0 %1341 }
 0x9cf   :  { %v1344_v10 = vmul.f32 %v3808_v7, %v1342_v8 }
 0x9d1   :  { %1346 = vrot.lane.b32.xlu0 %v1344_v10, %s3971_s26 }
 0xa2f   :  { %v1175_v12 = vpop.permute.xlu1 %1174 }
 0xa30   :  { %v1177_v13 = vadd.f32 %v1175_v12, %v1082_v53 }
 0xa32   :  { %3809 = vtanh.f32 %v1177_v13 }
 0xa3c   :  { %v3810_v14 = vpop.eup %3809 }
 0xa3d   :  { %1181 = vrot.lane.b32.xlu1 %v3810_v14, %s3973_s5 }
 0xa43   :  { %v1347_v16 = vpop.permute.xlu0 %1346 }
 0xa44   :  { %v1349_v17 = vadd.f32 %v1347_v16, %v1259_v57 }
 0xa46   :  { %3811 = vtanh.f32 %v1349_v17 }
 0xa50   :  { %v3812_v18 = vpop.eup %3811 }
 0xa51   :  { %1353 = vrot.lane.b32.xlu0 %v3812_v18, %s3973_s5 }
 0xaaf   :  { %v1182_v21 = vpop.permute.xlu1 %1181 }
 0xab0   :  { %v1184_v23 = vmul.f32 %v1182_v21, %v1179_v19 }
 0xab2   :  { %v4332_v24 = vadd.f32 %v1185_v22, %v1184_v23 }
 0xab4   :  { %1435 = vrot.lane.b32.xlu1 %v4332_v24, %s3973_s5 }
 0xac3   :  { %v1354_v26 = vpop.permute.xlu0 %1353 }
 0xac4   :  { %v1356_v28 = vmul.f32 %v1354_v26, %v1351_v25  ;;  %v3082_v26 = vld [vmem:[%s4569_s0 + $0xa] sm:$0x3] }
 0xac6   :  { %v4337_v29 = vadd.f32 %v1357_v27, %v1356_v28 }
 0xac8   :  { %1360 = vrot.lane.b32.xlu0 %v4337_v29, %s3973_s5 }
 0xb26   :  { %v1436_v31 = vpop.permute.xlu1 %1435 }
 0xb27   :  { %3412 = vmatmul.mubr.msk.f32.vlgmr.msra.gmra.mrb[16].mxu0 %vm201_vm3, %v1436_v31 }
 0xb28   :  { %3680 = vmatpush3.bf16.msra.mxu0 %v4166_v41  ;;  %3440 = vmatprep.mubr.msk.f32.mxu0 %vm3969_vm1, %v3970_v1 }
 0xb29   :  { %3681 = vmatprep.subr.bf16.mxu0 %v3968_v0 }
 0xb2c   :  { %3683 = vmatpush3.bf16.msra.mxu0 %v4170_v42 }
 0xb2d   :  { %3690 = vmatprep.subr.bf16.mxu0 %v3968_v0 }
 0xb3a   :  { %v1361_v30 = vpop.permute.xlu0 %1360 }
 0xb3b   :  { %3401 = vmatmul.mubr.msk.f32.vlgmr.msra.gmra.mrb[12].mxu1 %vm201_vm3, %v1361_v30 }
 0xb3c   :  { %3671 = vmatpush3.bf16.msra.mxu1 %v4102_v9  ;;  %3418 = vmatprep.mubr.msk.f32.mxu1 %vm3969_vm1, %v3970_v1 }
 0xb3d   :  { %3672 = vmatprep.subr.bf16.mxu1 %v3968_v0 }
 0xb3f   :  { %3419 = vmatmul.mubr.msk.f32.vlgmr.msra.gmra.mrb[14].mxu1 %vm127_vm2, %v3075_v32 }
 0xb40   :  { %3674 = vmatpush3.bf16.msra.mxu1 %v4094_v5  ;;  %3429 = vmatprep.mubr.msk.f32.mxu1 %vm3969_vm1, %v3970_v1 }
 0xb41   :  { %3675 = vmatprep.subr.bf16.mxu1 %v3968_v0 }
 0xb44   :  { %3677 = vmatpush3.bf16.msra.mxu1 %v4108_v11 }
 0xb45   :  { %3684 = vmatprep.subr.bf16.mxu1 %v3968_v0 }
 0xb47   :  { %3430 = vmatmul.mubr.msk.f32.vlgmr.msra.gmra.mrb[16].mxu1 %vm201_vm3, %v1361_v30 }
 0xb48   :  { %3686 = vmatpush3.bf16.msra.mxu1 %v4146_v34  ;;  %3451 = vmatprep.mubr.msk.f32.mxu1 %vm3969_vm1, %v3970_v1 }
 0xb49   :  { %3687 = vmatprep.subr.bf16.mxu1 %v3968_v0 }
 0xb4c   :  { %3689 = vmatpush3.bf16.msra.mxu1 %v4164_v40 }
 0xb4d   :  { %3699 = vmatprep.subr.bf16.mxu1 %v3968_v0 }
 0xbfa   :  { %v1505_v33 = vpop.f32.mrb[16].mxu0 }
 0xbfb   :  { %v1516_v35 = vadd.f32 %v1505_v33, %v4196_v54  ;;  %v3413_v36 = vpop.f32.mrb[17].mxu0 }
 0xbfd   :  { %1518 = vrot.lane.b32.xlu1 %v1516_v35, %s3971_s26 }
 0xc0e   :  { %v1430_v37 = vpop.f32.mrb[12].mxu1 }
 0xc0f   :  { %v3402_v38 = vpop.f32.mrb[13].mxu1  ;;  %v1431_v47 = vadd.f32 %v4222_v58, %v1430_v37 }
 0xc11   :  { %v1509_v48 = vadd.f32 %v1505_v33, %v1431_v47 }
 0xc12   :  { %v1607_v39 = vpop.f32.mrb[14].mxu1 }
 0xc13   :  { %v3420_v44 = vpop.f32.mrb[15].mxu1  ;;  %v3074_v49 = vmul.f32 -1.442695, %v1509_v48  ;;  %v1608_v52 = vadd.f32 %v4133_v20, %v1607_v39 }
 0xc15   :  { %3813 = vpow2.f32 %v3074_v49 }
 0xc1a   :  { %v1677_v45 = vpop.f32.mrb[16].mxu1 }
 0xc1b   :  { %v1688_v46 = vadd.f32 %v1677_v45, %v4125_v15  ;;  %v3431_v43 = vpop.f32.mrb[17].mxu1  ;;  %v1681_v53 = vadd.f32 %v1677_v45, %v1608_v52 }
 0xc1d   :  { %1690 = vrot.lane.b32.xlu0 %v1688_v46, %s3971_s26  ;;  %v3078_v57 = vmul.f32 -1.442695, %v1681_v53 }
 0xc1f   :  { %v3814_v50 = vpop.eup %3813 }
 0xc20   :  { %v1513_v51 = vadd.f32 1.0, %v3814_v50 }
 0xc22   :  { %3815 = vrcp.f32 %v1513_v51 }
 0xc23   :  { %3817 = vpow2.f32 %v3078_v57 }
 0xc2c   :  { %v3816_v55 = vpop.eup %3815 }
 0xc2d   :  { %v3818_v60 = vpop.eup %3817  ;;  %v1528_v12 = vsub.f32 1.0, %v3816_v55  ;;  %v1534_v14 = vmul.f32 %v3816_v55, %v4332_v24 }
 0xc2e   :  { %v1685_v61 = vadd.f32 1.0, %v3818_v60 }
 0xc30   :  { %3819 = vrcp.f32 %v1685_v61 }
 0xc3a   :  { %v3820_v62 = vpop.eup %3819 }
 0xc3b   :  { %v1700_v18 = vsub.f32 1.0, %v3820_v62  ;;  %v1706_v21 = vmul.f32 %v3820_v62, %v4337_v29 }
 0xc6f   :  { %v1519_v56 = vpop.permute.xlu1 %1518 }
 0xc70   :  { %v1521_v59 = vmul.f32 %v3816_v55, %v1519_v56 }
 0xc72   :  { %1523 = vrot.lane.b32.xlu1 %v1521_v59, %s3971_s26 }
 0xc8f   :  { %v1691_v63 = vpop.permute.xlu0 %1690 }
 0xc90   :  { %v1693_v2 = vmul.f32 %v3820_v62, %v1691_v63 }
 0xc92   :  { %1695 = vrot.lane.b32.xlu0 %v1693_v2, %s3971_s26 }
 0xce4   :  { %v1524_v3 = vpop.permute.xlu1 %1523 }
 0xce5   :  { %v1526_v4 = vadd.f32 %v1524_v3, %v1431_v47 }
 0xce7   :  { %3821 = vtanh.f32 %v1526_v4 }
 0xcf1   :  { %v3822_v6 = vpop.eup %3821 }
 0xcf2   :  { %1530 = vrot.lane.b32.xlu1 %v3822_v6, %s3973_s5 }
 0xd04   :  { %v1696_v7 = vpop.permute.xlu0 %1695 }
 0xd05   :  { %v1698_v8 = vadd.f32 %v1696_v7, %v1608_v52 }
 0xd07   :  { %3823 = vtanh.f32 %v1698_v8 }
 0xd11   :  { %v3824_v10 = vpop.eup %3823 }
 0xd12   :  { %1702 = vrot.lane.b32.xlu0 %v3824_v10, %s3973_s5 }
 0xd64   :  { %v1531_v13 = vpop.permute.xlu1 %1530 }
 0xd65   :  { %v1533_v16 = vmul.f32 %v1531_v13, %v1528_v12 }
 0xd67   :  { %v4381_v17 = vadd.f32 %v1534_v14, %v1533_v16 }
 0xd69   :  { %1784 = vrot.lane.b32.xlu1 %v4381_v17, %s3973_s5 }
 0xd84   :  { %v1703_v19 = vpop.permute.xlu0 %1702 }
 0xd85   :  { %v1705_v22 = vmul.f32 %v1703_v19, %v1700_v18  ;;  %v3089_v19 = vld [vmem:[%s4569_s0 + $0xc] sm:$0x3] }
 0xd87   :  { %v4386_v23 = vadd.f32 %v1706_v21, %v1705_v22 }
 0xd89   :  { %1709 = vrot.lane.b32.xlu0 %v4386_v23, %s3973_s5 }
 0xddb   :  { %v1785_v25 = vpop.permute.xlu1 %1784 }
 0xddc   :  { %3452 = vmatmul.mubr.msk.f32.vlgmr.msra.gmra.mrb[18].mxu1 %vm201_vm3, %v1785_v25 }
 0xddd   :  { %3701 = vmatpush3.bf16.msra.mxu1 %v4166_v41  ;;  %3480 = vmatprep.mubr.msk.f32.mxu1 %vm3969_vm1, %v3970_v1 }
 0xdde   :  { %3702 = vmatprep.subr.bf16.mxu1 %v3968_v0 }
 0xde1   :  { %3704 = vmatpush3.bf16.msra.mxu1 %v4170_v42 }
 0xde2   :  { %3711 = vmatprep.subr.bf16.mxu1 %v3968_v0 }
 0xdfb   :  { %v1710_v24 = vpop.permute.xlu0 %1709 }
 0xdfc   :  { %3441 = vmatmul.mubr.msk.f32.vlgmr.msra.gmra.mrb[18].mxu0 %vm201_vm3, %v1710_v24 }
 0xdfd   :  { %3692 = vmatpush3.bf16.msra.mxu0 %v4102_v9  ;;  %3458 = vmatprep.mubr.msk.f32.mxu0 %vm3969_vm1, %v3970_v1 }
 0xdfe   :  { %3693 = vmatprep.subr.bf16.mxu0 %v3968_v0 }
 0xe00   :  { %3459 = vmatmul.mubr.msk.f32.vlgmr.msra.gmra.mrb[20].mxu0 %vm127_vm2, %v3082_v26 }
 0xe01   :  { %3695 = vmatpush3.bf16.msra.mxu0 %v4094_v5  ;;  %3469 = vmatprep.mubr.msk.f32.mxu0 %vm3969_vm1, %v3970_v1 }
 0xe02   :  { %3696 = vmatprep.subr.bf16.mxu0 %v3968_v0 }
 0xe05   :  { %3698 = vmatpush3.bf16.msra.mxu0 %v4108_v11 }
 0xe06   :  { %3705 = vmatprep.subr.bf16.mxu0 %v3968_v0 }
 0xe08   :  { %3470 = vmatmul.mubr.msk.f32.vlgmr.msra.gmra.mrb[22].mxu0 %vm201_vm3, %v1710_v24 }
 0xe09   :  { %3707 = vmatpush3.bf16.msra.mxu0 %v4146_v34  ;;  %3491 = vmatprep.mubr.msk.f32.mxu0 %vm3969_vm1, %v3970_v1 }
 0xe0a   :  { %3708 = vmatprep.subr.bf16.mxu0 %v3968_v0 }
 0xe0d   :  { %3710 = vmatpush3.bf16.msra.mxu0 %v4164_v40 }
 0xe0e   :  { %3720 = vmatprep.subr.bf16.mxu0 %v3968_v0 }
 0xeaf   :  { %v1854_v27 = vpop.f32.mrb[18].mxu1 }
 0xeb0   :  { %v1865_v28 = vadd.f32 %v1854_v27, %v4196_v54  ;;  %v3453_v29 = vpop.f32.mrb[19].mxu1 }
 0xeb2   :  { %1867 = vrot.lane.b32.xlu0 %v1865_v28, %s3971_s26 }
 0xecf   :  { %v1779_v31 = vpop.f32.mrb[18].mxu0 }
 0xed0   :  { %v3442_v30 = vpop.f32.mrb[19].mxu0  ;;  %v1780_v38 = vadd.f32 %v4222_v58, %v1779_v31 }
 0xed2   :  { %v1858_v39 = vadd.f32 %v1854_v27, %v1780_v38 }
 0xed3   :  { %v1956_v32 = vpop.f32.mrb[20].mxu0 }
 0xed4   :  { %v3460_v33 = vpop.f32.mrb[21].mxu0  ;;  %v3081_v44 = vmul.f32 -1.442695, %v1858_v39  ;;  %v1957_v49 = vadd.f32 %v4133_v20, %v1956_v32 }
 0xed6   :  { %3825 = vpow2.f32 %v3081_v44 }
 0xedb   :  { %v2026_v35 = vpop.f32.mrb[22].mxu0 }
 0xedc   :  { %v2037_v36 = vadd.f32 %v2026_v35, %v4125_v15  ;;  %v3471_v37 = vpop.f32.mrb[23].mxu0  ;;  %v2030_v50 = vadd.f32 %v2026_v35, %v1957_v49 }
 0xede   :  { %2039 = vrot.lane.b32.xlu1 %v2037_v36, %s3971_s26  ;;  %v3085_v51 = vmul.f32 -1.442695, %v2030_v50 }
 0xee0   :  { %v3826_v45 = vpop.eup %3825 }
 0xee1   :  { %v1862_v46 = vadd.f32 1.0, %v3826_v45 }
 0xee3   :  { %3827 = vrcp.f32 %v1862_v46 }
 0xee4   :  { %3829 = vpow2.f32 %v3085_v51 }
 0xeed   :  { %v3828_v43 = vpop.eup %3827 }
 0xeee   :  { %v3830_v52 = vpop.eup %3829  ;;  %v1877_v3 = vsub.f32 1.0, %v3828_v43  ;;  %v1883_v6 = vmul.f32 %v3828_v43, %v4381_v17 }
 0xeef   :  { %v2034_v53 = vadd.f32 1.0, %v3830_v52 }
 0xef1   :  { %3831 = vrcp.f32 %v2034_v53 }
 0xefb   :  { %v3832_v55 = vpop.eup %3831 }
 0xefc   :  { %v2049_v10 = vsub.f32 1.0, %v3832_v55  ;;  %v2055_v13 = vmul.f32 %v3832_v55, %v4386_v23 }
 0xf24   :  { %v1868_v47 = vpop.permute.xlu0 %1867 }
 0xf25   :  { %v1870_v48 = vmul.f32 %v3828_v43, %v1868_v47 }
 0xf27   :  { %1872 = vrot.lane.b32.xlu0 %v1870_v48, %s3971_s26 }
 0xf50   :  { %v2040_v56 = vpop.permute.xlu1 %2039 }
 0xf51   :  { %v2042_v57 = vmul.f32 %v3832_v55, %v2040_v56 }
 0xf53   :  { %2044 = vrot.lane.b32.xlu1 %v2042_v57, %s3971_s26 }
 0xf99   :  { %v1873_v59 = vpop.permute.xlu0 %1872 }
 0xf9a   :  { %v1875_v60 = vadd.f32 %v1873_v59, %v1780_v38 }
 0xf9c   :  { %3833 = vtanh.f32 %v1875_v60 }
 0xfa6   :  { %v3834_v61 = vpop.eup %3833 }
 0xfa7   :  { %1879 = vrot.lane.b32.xlu0 %v3834_v61, %s3973_s5 }
 0xfc5   :  { %v2045_v62 = vpop.permute.xlu1 %2044 }
 0xfc6   :  { %v2047_v63 = vadd.f32 %v2045_v62, %v1957_v49 }
 0xfc8   :  { %3835 = vtanh.f32 %v2047_v63 }
 0xfd2   :  { %v3836_v2 = vpop.eup %3835 }
 0xfd3   :  { %2051 = vrot.lane.b32.xlu1 %v3836_v2, %s3973_s5 }
0x1019   :  { %v1880_v4 = vpop.permute.xlu0 %1879 }
0x101a   :  { %v1882_v7 = vmul.f32 %v1880_v4, %v1877_v3 }
0x101c   :  { %v4430_v8 = vadd.f32 %v1883_v6, %v1882_v7 }
0x101e   :  { %2133 = vrot.lane.b32.xlu0 %v4430_v8, %s3973_s5 }
0x1045   :  { %v2052_v12 = vpop.permute.xlu1 %2051 }
0x1046   :  { %v2054_v14 = vmul.f32 %v2052_v12, %v2049_v10 }
0x1048   :  { %v4435_v16 = vadd.f32 %v2055_v13, %v2054_v14 }
0x104a   :  { %2058 = vrot.lane.b32.xlu1 %v4435_v16, %s3973_s5 }
0x1090   :  { %v2134_v18 = vpop.permute.xlu0 %2133 }
0x1091   :  { %3492 = vmatmul.mubr.msk.f32.vlgmr.msra.gmra.mrb[24].mxu0 %vm201_vm3, %v2134_v18 }
0x1092   :  { %3722 = vmatpush3.bf16.msra.mxu0 %v4166_v41  ;;  %3520 = vmatprep.mubr.msk.f32.mxu0 %vm3969_vm1, %v3970_v1 }
0x1093   :  { %3723 = vmatprep.subr.bf16.mxu0 %v3968_v0 }
0x1096   :  { %3725 = vmatpush3.bf16.msra.mxu0 %v4170_v42 }
0x1097   :  { %3732 = vmatprep.subr.bf16.mxu0 %v3968_v0 }
0x10bc   :  { %v2059_v17 = vpop.permute.xlu1 %2058 }
0x10bd   :  { %3481 = vmatmul.mubr.msk.f32.vlgmr.msra.gmra.mrb[20].mxu1 %vm201_vm3, %v2059_v17 }
0x10be   :  { %3713 = vmatpush3.bf16.msra.mxu1 %v4102_v9  ;;  %3498 = vmatprep.mubr.msk.f32.mxu1 %vm3969_vm1, %v3970_v1 }
0x10bf   :  { %3714 = vmatprep.subr.bf16.mxu1 %v3968_v0 }
0x10c1   :  { %3499 = vmatmul.mubr.msk.f32.vlgmr.msra.gmra.mrb[22].mxu1 %vm127_vm2, %v3089_v19 }
0x10c2   :  { %3716 = vmatpush3.bf16.msra.mxu1 %v4094_v5  ;;  %3509 = vmatprep.mubr.msk.f32.mxu1 %vm3969_vm1, %v3970_v1 }
0x10c3   :  { %3717 = vmatprep.subr.bf16.mxu1 %v3968_v0 }
0x10c6   :  { %3719 = vmatpush3.bf16.msra.mxu1 %v4108_v11 }
0x10c7   :  { %3726 = vmatprep.subr.bf16.mxu1 %v3968_v0 }
0x10c9   :  { %3510 = vmatmul.mubr.msk.f32.vlgmr.msra.gmra.mrb[24].mxu1 %vm201_vm3, %v2059_v17 }
0x10ca   :  { %3728 = vmatpush3.bf16.msra.mxu1 %v4146_v34  ;;  %3531 = vmatprep.mubr.msk.f32.mxu1 %vm3969_vm1, %v3970_v1 }
0x10cb   :  { %3729 = vmatprep.subr.bf16.mxu1 %v3968_v0 }
0x10ce   :  { %3731 = vmatpush3.bf16.msra.mxu1 %v4164_v40 }
0x10cf   :  { %3741 = vmatprep.subr.bf16.mxu1 %v3968_v0 }
0x1164   :  { %v2203_v21 = vpop.f32.mrb[24].mxu0 }
0x1165   :  { %v2214_v22 = vadd.f32 %v2203_v21, %v4196_v54  ;;  %v3493_v23 = vpop.f32.mrb[25].mxu0 }
0x1167   :  { %2216 = vrot.lane.b32.xlu0 %v2214_v22, %s3971_s26 }
0x1190   :  { %v2128_v25 = vpop.f32.mrb[20].mxu1 }
0x1191   :  { %v3482_v24 = vpop.f32.mrb[21].mxu1  ;;  %v2129_v30 = vadd.f32 %v4222_v58, %v2128_v25 }
0x1193   :  { %v2207_v32 = vadd.f32 %v2203_v21, %v2129_v30 }
0x1194   :  { %v2305_v26 = vpop.f32.mrb[22].mxu1 }
0x1195   :  { %v3500_v27 = vpop.f32.mrb[23].mxu1  ;;  %v3088_v33 = vmul.f32 -1.442695, %v2207_v32  ;;  %v2306_v44 = vadd.f32 %v4133_v20, %v2305_v26 }
0x1197   :  { %3837 = vpow2.f32 %v3088_v33 }
0x119c   :  { %v2375_v28 = vpop.f32.mrb[24].mxu1 }
0x119d   :  { %v2386_v29 = vadd.f32 %v2375_v28, %v4125_v15  ;;  %v3511_v31 = vpop.f32.mrb[25].mxu1  ;;  %v2379_v45 = vadd.f32 %v2375_v28, %v2306_v44 }
0x119f   :  { %2388 = vrot.lane.b32.xlu1 %v2386_v29, %s3971_s26  ;;  %v3092_v46 = vmul.f32 -1.442695, %v2379_v45 }
0x11a1   :  { %v3838_v35 = vpop.eup %3837 }
0x11a2   :  { %v2211_v36 = vadd.f32 1.0, %v3838_v35 }
0x11a4   :  { %3839 = vrcp.f32 %v2211_v36 }
0x11a5   :  { %3841 = vpow2.f32 %v3092_v46 }
0x11ae   :  { %v3840_v37 = vpop.eup %3839 }
0x11af   :  { %v3842_v43 = vpop.eup %3841  ;;  %v2226_v57 = vsub.f32 1.0, %v3840_v37  ;;  %v2232_v60 = vmul.f32 %v3840_v37, %v4430_v8 }
0x11b0   :  { %v2383_v47 = vadd.f32 1.0, %v3842_v43 }
0x11b2   :  { %3843 = vrcp.f32 %v2383_v47 }
0x11bc   :  { %v3844_v48 = vpop.eup %3843 }
0x11bd   :  { %v2398_v63 = vsub.f32 1.0, %v3844_v48  ;;  %v2404_v3 = vmul.f32 %v3844_v48, %v4435_v16 }
0x11d9   :  { %v2217_v38 = vpop.permute.xlu0 %2216 }
0x11da   :  { %v2219_v39 = vmul.f32 %v3840_v37, %v2217_v38 }
0x11dc   :  { %2221 = vrot.lane.b32.xlu0 %v2219_v39, %s3971_s26 }
0x1211   :  { %v2389_v49 = vpop.permute.xlu1 %2388 }
0x1212   :  { %v2391_v50 = vmul.f32 %v3844_v48, %v2389_v49 }
0x1214   :  { %2393 = vrot.lane.b32.xlu1 %v2391_v50, %s3971_s26 }
0x124e   :  { %v2222_v51 = vpop.permute.xlu0 %2221 }
0x124f   :  { %v2224_v52 = vadd.f32 %v2222_v51, %v2129_v30 }
0x1251   :  { %3845 = vtanh.f32 %v2224_v52 }
0x125b   :  { %v3846_v53 = vpop.eup %3845 }
0x125c   :  { %2228 = vrot.lane.b32.xlu0 %v3846_v53, %s3973_s5 }
0x1286   :  { %v2394_v55 = vpop.permute.xlu1 %2393 }
0x1287   :  { %v2396_v56 = vadd.f32 %v2394_v55, %v2306_v44 }
0x1289   :  { %3847 = vtanh.f32 %v2396_v56 }
0x1293   :  { %v3848_v20 = vpop.eup %3847 }
0x1294   :  { %2400 = vrot.lane.b32.xlu1 %v3848_v20, %s3973_s5 }
0x12ce   :  { %v2229_v59 = vpop.permute.xlu0 %2228 }
0x12cf   :  { %v2231_v61 = vmul.f32 %v2229_v59, %v2226_v57 }
0x12d1   :  { %v4479_v62 = vadd.f32 %v2232_v60, %v2231_v61  ;;  %v3868_v60 = vld [vmem:[#allocation6] ss:$0 sm:$0xff] }
0x12d3   :  { %2482 = vrot.lane.b32.xlu0 %v4479_v62, %s3973_s5 }
0x1306   :  { %v2401_v2 = vpop.permute.xlu1 %2400 }
0x1307   :  { %v2403_v4 = vmul.f32 %v2401_v2, %v2398_v63 }
0x1309   :  { %v4484_v6 = vadd.f32 %v2404_v3, %v2403_v4 }
0x130b   :  { %2407 = vrot.lane.b32.xlu1 %v4484_v6, %s3973_s5 }
0x1345   :  { %v2483_v7 = vpop.permute.xlu0 %2482 }
0x1346   :  { %3532 = vmatmul.mubr.msk.f32.vlgmr.msra.gmra.mrb[26].mxu1 %vm201_vm3, %v2483_v7 }
0x1347   :  { %3743 = vmatpush3.bf16.msra.mxu1 %v4166_v41  ;;  %3560 = vmatprep.mubr.msk.f32.mxu1 %vm3969_vm1, %v3970_v1  ;;  %v3096_v41 = vld [vmem:[%s4569_s0 + $0xe] sm:$0x3] }
0x1348   :  { %3744 = vmatprep.subr.bf16.mxu1 %v3968_v0 }
0x134b   :  { %3746 = vmatpush3.bf16.msra.mxu1 %v4170_v42 }
0x134c   :  { %3753 = vmatprep.subr.bf16.mxu1 %v3968_v0 }
0x137d   :  { %v2408_v8 = vpop.permute.xlu1 %2407 }
0x137e   :  { %3521 = vmatmul.mubr.msk.f32.vlgmr.msra.gmra.mrb[26].mxu0 %vm201_vm3, %v2408_v8 }
0x137f   :  { %3734 = vmatpush3.bf16.msra.mxu0 %v4102_v9  ;;  %3538 = vmatprep.mubr.msk.f32.mxu0 %vm3969_vm1, %v3970_v1 }
0x1380   :  { %3735 = vmatprep.subr.bf16.mxu0 %v3968_v0 }
0x1382   :  { %3539 = vmatmul.mubr.msk.f32.vlgmr.msra.gmra.mrb[28].mxu0 %vm127_vm2, %v3096_v41  ;;  %v2944_v41 = vld [vmem:[%s4578_s9 + $0x8] sm:$0xff] }
0x1383   :  { %3737 = vmatpush3.bf16.msra.mxu0 %v4094_v5  ;;  %3549 = vmatprep.mubr.msk.f32.mxu0 %vm3969_vm1, %v3970_v1 }
0x1384   :  { %3738 = vmatprep.subr.bf16.mxu0 %v3968_v0 }
0x1387   :  { %3740 = vmatpush3.bf16.msra.mxu0 %v4108_v11 }
0x1388   :  { %3747 = vmatprep.subr.bf16.mxu0 %v3968_v0 }
0x138a   :  { %3550 = vmatmul.mubr.msk.f32.vlgmr.msra.gmra.mrb[30].mxu0 %vm201_vm3, %v2408_v8  ;;  %v2943_v8 = vld [vmem:[%s4578_s9] sm:$0xff] }
0x138b   :  { %3749 = vmatpush3.bf16.msra.mxu0 %v4146_v34  ;;  %3571 = vmatprep.mubr.msk.f32.mxu0 %vm3969_vm1, %v3970_v1 }
0x138c   :  { %3750 = vmatprep.subr.bf16.mxu0 %v3968_v0 }
0x138f   :  { %3752 = vmatpush3.bf16.msra.mxu0 %v4164_v40 }
0x1419   :  { %v2552_v5 = vpop.f32.mrb[26].mxu1 }
0x141a   :  { %v2563_v9 = vadd.f32 %v2552_v5, %v4196_v54  ;;  %v3533_v42 = vpop.f32.mrb[27].mxu1 }
0x141b   :  { %v2946_v42 = vld [vmem:[%s4578_s9 + $0x18] sm:$0xff] }
0x141c   :  { %2565 = vrot.lane.b32.xlu0 %v2563_v9, %s3971_s26  ;;  %v3754_v9 = vpack.c.bf16 %v2944_v41, %v2943_v8 }
0x1451   :  { %v2477_v11 = vpop.f32.mrb[26].mxu0 }
0x1452   :  { %v3522_v10 = vpop.f32.mrb[27].mxu0  ;;  %v2478_v18 = vadd.f32 %v4222_v58, %v2477_v11 }
0x1454   :  { %v2556_v17 = vadd.f32 %v2552_v5, %v2478_v18  ;;  %v2945_v5 = vld [vmem:[%s4578_s9 + $0x10] sm:$0xff]  ;;  %s3974_s9 = smov [#allocation9]  }
0x1455   :  { %v2654_v12 = vpop.f32.mrb[28].mxu0  ;;  %v3757_v11 = vpack.c.bf16 %v2946_v42, %v2945_v5 }
0x1456   :  { %v3540_v13 = vpop.f32.mrb[29].mxu0  ;;  %v3095_v40 = vmul.f32 -1.442695, %v2556_v17  ;;  %v3103_v17 = vld [vmem:[#allocation8] ss:$0 sm:$0xff] }
0x1458   :  { %3849 = vpow2.f32 %v3095_v40 }
0x145d   :  { %v2724_v14 = vpop.f32.mrb[30].mxu0 }
0x145e   :  { %v2735_v34 = vadd.f32 %v2724_v14, %v4125_v15  ;;  %v3551_v16 = vpop.f32.mrb[31].mxu0  ;;  %v3867_v15 = vld [vmem:[%s4571_s2] ss:$0 sm:$0xff] }
0x145f   :  { %v2655_v24 = vadd.f32 %v3867_v15, %v2654_v12 }
0x1460   :  { %2737 = vrot.lane.b32.xlu1 %v2735_v34, %s3971_s26 }
0x1461   :  { %v2728_v26 = vadd.f32 %v2724_v14, %v2655_v24 }
0x1462   :  { %v3850_v19 = vpop.eup %3849 }
0x1463   :  { %v2560_v21 = vadd.f32 1.0, %v3850_v19  ;;  %v3099_v27 = vmul.f32 -1.442695, %v2728_v26 }
0x1465   :  { %3851 = vrcp.f32 %v2560_v21 }
0x1466   :  { %3853 = vpow2.f32 %v3099_v27 }
0x146f   :  { %v3852_v22 = vpop.eup %3851 }
0x1470   :  { %v3854_v58 = vpop.eup %3853  ;;  %v2575_v39 = vsub.f32 1.0, %v3852_v22  ;;  %v2581_v45 = vmul.f32 %v3852_v22, %v4479_v62 }
0x1471   :  { %v2732_v28 = vadd.f32 1.0, %v3854_v58 }
0x1473   :  { %3855 = vrcp.f32 %v2732_v28 }
0x147d   :  { %v3856_v29 = vpop.eup %3855 }
0x147e   :  { %v2747_v47 = vsub.f32 1.0, %v3856_v29  ;;  %v2753_v49 = vmul.f32 %v3856_v29, %v4484_v6 }
0x148e   :  { %v2566_v23 = vpop.permute.xlu0 %2565 }
0x148f   :  { %v2568_v25 = vmul.f32 %v3852_v22, %v2566_v23 }
0x1491   :  { %2570 = vrot.lane.b32.xlu0 %v2568_v25, %s3971_s26 }
0x14d2   :  { %v2738_v31 = vpop.permute.xlu1 %2737 }
0x14d3   :  { %v2740_v30 = vmul.f32 %v3856_v29, %v2738_v31 }
0x14d5   :  { %2742 = vrot.lane.b32.xlu1 %v2740_v30, %s3971_s26 }
0x1503   :  { %v2571_v32 = vpop.permute.xlu0 %2570 }
0x1504   :  { %v2573_v33 = vadd.f32 %v2571_v32, %v2478_v18 }
0x1506   :  { %3857 = vtanh.f32 %v2573_v33 }
0x1510   :  { %v3858_v35 = vpop.eup %3857 }
0x1511   :  { %2577 = vrot.lane.b32.xlu0 %v3858_v35, %s3973_s5 }
0x1547   :  { %v2743_v36 = vpop.permute.xlu1 %2742 }
0x1548   :  { %v2745_v37 = vadd.f32 %v2743_v36, %v2655_v24 }
0x154a   :  { %3859 = vtanh.f32 %v2745_v37 }
0x1554   :  { %v3860_v38 = vpop.eup %3859 }
0x1555   :  { %2749 = vrot.lane.b32.xlu1 %v3860_v38, %s3973_s5 }
0x1583   :  { %v2578_v44 = vpop.permute.xlu0 %2577 }
0x1584   :  { %v2580_v46 = vmul.f32 %v2578_v44, %v2575_v39 }
0x1586   :  { %v2582_v43 = vadd.f32 %v2581_v45, %v2580_v46 }
0x1588   :  { %2831 = vrot.lane.b32.xlu0 %v2582_v43, %s3973_s5 }
0x15c7   :  { %v2750_v48 = vpop.permute.xlu1 %2749 }
0x15c8   :  { %v2752_v50 = vmul.f32 %v2750_v48, %v2747_v47 }
0x15ca   :  { %v2754_v51 = vadd.f32 %v2753_v49, %v2752_v50 }
0x15cc   :  { %2756 = vrot.lane.b32.xlu1 %v2754_v51, %s3973_s5 }
0x15fa   :  { %v2832_v52 = vpop.permute.xlu0 %2831 }
0x15fb   :  { %3572 = vmatmul.mubr.msk.f32.vlgmr.msra.gmra.mrb[32].mxu0 %vm201_vm3, %v2832_v52 }
0x163e   :  { %v2757_v53 = vpop.permute.xlu1 %2756 }
0x163f   :  { %2934 = vst.msk [vmem:[#allocation2] sm:$0x3] %vm80_vm0, %v2757_v53  ;;  %3561 = vmatmul.mubr.msk.f32.vlgmr.msra.gmra.mrb[28].mxu1 %vm201_vm3, %v2757_v53 }
0x1640   :  { %3582 = vmatprep.mubr.msk.f32.mxu1 %vm3969_vm1, %v3970_v1  ;;  %3755 = vmatpush3.bf16.msra.mxu1 %v3754_v9 }
0x1641   :  { %3756 = vmatprep.subr.bf16.mxu1 %v3968_v0 }
0x1644   :  { %3758 = vmatpush3.bf16.msra.mxu1 %v3757_v11 }
0x16ce   :  { %v2901_v55 = vpop.f32.mrb[32].mxu0 }
0x16cf   :  { %v2912_v56 = vadd.f32 %v2901_v55, %v4196_v54  ;;  %v3573_v20 = vpop.f32.mrb[33].mxu0 }
0x16d1   :  { %2914 = vrot.lane.b32.xlu0 %v2912_v56, %s3971_s26 }
0x1712   :  { %v2826_v57 = vpop.f32.mrb[28].mxu1 }
0x1713   :  { %v3562_v59 = vpop.f32.mrb[29].mxu1  ;;  %v2827_v61 = vadd.f32 %v3868_v60, %v2826_v57 }
0x1715   :  { %v2905_v62 = vadd.f32 %v2901_v55, %v2827_v61 }
0x1717   :  { %v3102_v63 = vmul.f32 -1.442695, %v2905_v62 }
0x1719   :  { %3861 = vpow2.f32 %v3102_v63 }
0x1723   :  { %v3862_v2 = vpop.eup %3861 }
0x1724   :  { %v2909_v3 = vadd.f32 1.0, %v3862_v2 }
0x1726   :  { %3863 = vrcp.f32 %v2909_v3 }
0x1730   :  { %v3864_v4 = vpop.eup %3863 }
0x1731   :  { %v2924_v12 = vsub.f32 1.0, %v3864_v4  ;;  %v2930_v14 = vmul.f32 %v3864_v4, %v2582_v43 }
0x1743   :  { %v2915_v6 = vpop.permute.xlu0 %2914 }
0x1744   :  { %v2917_v7 = vmul.f32 %v3864_v4, %v2915_v6 }
0x1746   :  { %2919 = vrot.lane.b32.xlu1 %v2917_v7, %s3971_s26  ;;  %s3034_s26 = sshll.u32 %s3974_s9, 4  ;;  %s3035_s26 = int_to_ptr.vmem [resolvable:$true] %s3034_s26 }
0x1747   :  { %s3935_s23 = scalar_lea.vmem %s3035_s26, 32  ;;  %p3940_p11 = scmp.lt.s32.totalorder %s3035_s26, %s3035_s26 }
0x1748   :  { %p3936_p10 = scmp.ne.s32.totalorder %s3035_s26, %s3935_s23  ;;  %p3941_p12 = scmp.lt.s32.totalorder %s3935_s23, %s3935_s23 }
0x174a   :  { %p3942_p13 = por %p3941_p12, %p3940_p11 }
0x174c   :  { %p3943_p0 = pnand %p3942_p13, %p3936_p10 }
0x17b8   :  { %v2920_v1 = vpop.permute.xlu1 %2919 }
0x17b9   :  { %v2922_v54 = vadd.f32 %v2920_v1, %v2827_v61 }
0x17bb   :  { %3865 = vtanh.f32 %v2922_v54 }
0x17c5   :  { %v3866_v10 = vpop.eup %3865 }
0x17c6   :  { %2926 = vrot.lane.b32.xlu0 %v3866_v10, %s3973_s5 }
0x1838   :  { %v2927_v13 = vpop.permute.xlu0 %2926 }
0x1839   :  { %v2929_v34 = vmul.f32 %v2927_v13, %v2924_v12 }
0x183b   :  { %v2931_v16 = vadd.f32 %v2930_v14, %v2929_v34 }
0x183d   :  { %2936 = vrot.lane.b32.xlu1 %v2931_v16, %s3973_s5 }
0x18af   :  { %v2937_v18 = vpop.permute.xlu1 %2936 }
0x18b0   :  { %2939 = vst.msk [vmem:[#allocation2 + $0x2] sm:$0x3] %vm80_vm0, %v2937_v18  ;;  %3583 = vmatmul.mubr.msk.f32.vlgmr.msra.gmra.mrb[30].mxu1 %vm201_vm3, %v2937_v18 }
0x1983   :  { %v3022_v0 = vpop.f32.mrb[30].mxu1 }
0x1984   :  { %v3023_v40 = vadd.f32 %v3103_v17, %v3022_v0  ;;  %v3584_v19 = vpop.f32.mrb[31].mxu1 }
0x1986   :  { %3027 = vst.msk [vmem:[#allocation9] sm:$0x3] %vm3026_vm4, %v3023_v40 }
0x1987   :  { %3946 = shalt.err (!%p3943_p0)
}
0x1988   :  { %s3947_s24 = scalar_lea.hbm %s4580_s11, 32 }
0x1989   :  { %p3948_p1 = scmp.ne.s32.totalorder %s4580_s11, %s3947_s24  ;;  %p3951_p2 = scmp.lt.u32.totalorder %s3947_s24, %s4580_s11 }
0x198b   :  { %p3953_p3 = pnand %p3951_p2, %p3948_p1 }
0x198d   :  { %3956 = shalt.err (!%p3953_p3)
}
0x198e   :  { %3037 = dma.vmem_to_hbm [thread:$0]  %s3035_s26, 32, %s4580_s11, [#allocation5]  }
0x198f   :  { %3961 = dma.done.wait [#allocation5], 32  }
0x1990   :  { %3962 = vsyncadd [#allocation5], 4294967264 }
0x1991   :  { %3041 = vsyncpa [#allocation4], 1 }
0x1992   :  { %3042 = vsyncpa [#allocation7], 1 }
0x1993   :  { %3043 = vsyncpa [#allocation5], 1 }

</bundles_post_ra>
